<compile_context>
chip_gen: v5e
topology: v5e:2x2
jax: 0.10.0
libtpu: 0.0.40
codegen_flags: <defaults>
</compile_context>

<pallas_src>
import functools

import numpy as np
import jax
import jax.numpy as jnp
from jax import lax
from jax.experimental import pallas as pl
from jax.experimental.pallas import tpu as pltpu


# ----------------------------------------------------------------------------
# Fused Pallas kernel: conv0 -> maxpool -> ResidualBlock -> ResidualBlock
# ----------------------------------------------------------------------------
def _fused_residual_layer_kernel(x_ref, m0_ref, b0_ref, rowsel_ref, colsel_ref,
                                 mrb_ref, brb_ref, o_ref, *,
                                 H, W, Cin, Cout, Ho, Wo):
    f32 = jnp.float32
    WC_in = W * Cin
    WC_out = W * Cout
    WoC = Wo * Cout

    # ---- conv0: 3x3 SAME stride 1, as 3 banded matmuls ----------------------
    x = x_ref[0].astype(f32)                                    # (H, W*Cin)
    zin = jnp.zeros((1, WC_in), f32)
    xp = jnp.concatenate([zin, x, zin], axis=0)                 # (H+2, W*Cin) zero row-pad
    acc = jnp.broadcast_to(b0_ref[...].astype(f32), (H, WC_out))  # bias folded into init
    for kh in range(3):
        acc = acc + jnp.dot(xp[kh:kh + H, :], m0_ref[kh],
                            preferred_element_type=f32)
    a = acc                                                     # (H, W*Cout) lane-dense

    # ---- maxpool 3x3 stride 2 pad 1 (edge-replicate == -inf padding) --------
    up = jnp.concatenate([a[1:, :], a[H - 1:H, :]], axis=0)     # row h+1 (clamped)
    dn = jnp.concatenate([a[0:1, :], a[:H - 1, :]], axis=0)     # row h-1 (clamped)
    g1 = jnp.maximum(a, jnp.maximum(up, dn))                    # stride-1 row max (H, W*Cout)
    # exact 0/1 selection matmuls: pick rows 2i, then columns clamp(2j+dw)
    g = jnp.dot(rowsel_ref[...], g1, preferred_element_type=f32)         # (Ho, W*Cout)
    p = jnp.maximum(
        jnp.dot(g, colsel_ref[0], preferred_element_type=f32),
        jnp.maximum(jnp.dot(g, colsel_ref[1], preferred_element_type=f32),
                    jnp.dot(g, colsel_ref[2], preferred_element_type=f32)))  # (Ho, Wo*Cout)

    # ---- two residual blocks: x + conv2(relu(conv1(relu(x)))) ---------------
    zrb = jnp.zeros((1, WoC), f32)
    out = p
    for blk in range(2):
        identity = out
        h = out
        for c in range(2):
            idx = 2 * blk + c
            r = jnp.maximum(h, 0.0)
            rp = jnp.concatenate([zrb, r, zrb], axis=0)         # (Ho+2, Wo*Cout)
            acc = jnp.broadcast_to(brb_ref[idx].astype(f32), (Ho, WoC))
            for kh in range(3):
                acc = acc + jnp.dot(rp[kh:kh + Ho, :], mrb_ref[idx, kh],
                                    preferred_element_type=f32)
            h = acc
        out = identity + h

    o_ref[0] = out.astype(o_ref.dtype)


# ----------------------------------------------------------------------------
# Wrapper glue: banded weight matrices, pool selection matrices, BlockSpecs
# ----------------------------------------------------------------------------
def _banded_weight(w, W):
    """w: (3,3,Cin,Cout) HWIO -> (3, W*Cin, W*Cout) banded matrices so that
    out[h, s*Cout+co] = sum_kh xpad[h+kh] @ M[kh] is a 3x3 SAME conv
    (W-direction zero padding folded into M)."""
    _, _, Cin, Cout = w.shape
    eyes = jnp.stack([jnp.eye(W, k=1 - kw, dtype=w.dtype) for kw in range(3)])  # (kw, r, s)
    m = jnp.einsum('wrs,hwio->hriso', eyes, w)          # (kh, r, Cin, s, Cout)
    return m.reshape(3, W * Cin, W * Cout)


def _pool_selectors(H, W, C, Ho, Wo, dtype=np.float32):
    """Exact 0/1 selection matrices for maxpool(3, stride=2, pad=1)."""
    rowsel = np.zeros((Ho, H), dtype)
    rowsel[np.arange(Ho), np.clip(2 * np.arange(Ho), 0, H - 1)] = 1.0
    colsel = np.zeros((3, W * C, Wo * C), dtype)
    eye_c = np.eye(C, dtype=dtype)
    for t, dw in enumerate((-1, 0, 1)):
        ind = np.zeros((W, Wo), dtype)
        src = np.clip(2 * np.arange(Wo) + dw, 0, W - 1)   # clamp == -inf pad for max
        ind[src, np.arange(Wo)] = 1.0
        colsel[t] = np.kron(ind, eye_c)
    return jnp.asarray(rowsel), jnp.asarray(colsel)


def residual_layer_forward(x_nhwc, params):
    """Forward pass of ResidualLayer on NHWC input (single fused kernel)."""
    N, H, W, Cin = x_nhwc.shape
    Cout = params["w0"].shape[-1]
    Ho = (H + 2 - 3) // 2 + 1
    Wo = (W + 2 - 3) // 2 + 1

    # Lane-dense 2D views + precomputed matrices (pure glue, outside the kernel)
    x2 = x_nhwc.reshape(N, H, W * Cin)
    m0 = _banded_weight(params["w0"], W)                                   # (3, W*Cin, W*Cout)
    b0 = jnp.tile(params["b0"], W).reshape(1, W * Cout)
    rowsel, colsel = _pool_selectors(H, W, Cout, Ho, Wo)
    mrb = jnp.stack([_banded_weight(params[blk][wk], Wo)
                     for blk in ("rb1", "rb2") for wk in ("w1", "w2")])    # (4,3,WoC,WoC)
    brb = jnp.stack([jnp.tile(params[blk][bk], Wo).reshape(1, Wo * Cout)
                     for blk in ("rb1", "rb2") for bk in ("b1", "b2")])    # (4,1,WoC)

    kernel = functools.partial(_fused_residual_layer_kernel,
                               H=H, W=W, Cin=Cin, Cout=Cout, Ho=Ho, Wo=Wo)
    out2 = pl.pallas_call(
        kernel,
        out_shape=jax.ShapeDtypeStruct((N, Ho, Wo * Cout), x_nhwc.dtype),
        grid=(N,),
        in_specs=[
            pl.BlockSpec((1, H, W * Cin), lambda n: (n, 0, 0)),
            pl.BlockSpec(m0.shape, lambda n: (0, 0, 0)),
            pl.BlockSpec(b0.shape, lambda n: (0, 0)),
            pl.BlockSpec(rowsel.shape, lambda n: (0, 0)),
            pl.BlockSpec(colsel.shape, lambda n: (0, 0, 0)),
            pl.BlockSpec(mrb.shape, lambda n: (0, 0, 0, 0)),
            pl.BlockSpec(brb.shape, lambda n: (0, 0, 0)),
        ],
        out_specs=pl.BlockSpec((1, Ho, Wo * Cout), lambda n: (n, 0, 0)),
        compiler_params=pltpu.CompilerParams(dimension_semantics=("parallel",)),
    )(x2, m0, b0, rowsel, colsel, mrb, brb)
    return out2.reshape(N, Ho, Wo, Cout)


# ----------------------------------------------------------------------------
# Pure-JAX reference (correctness check only)
# ----------------------------------------------------------------------------
def _conv_ref(x, w, b):
    y = lax.conv_general_dilated(
        x, w, window_strides=(1, 1), padding="SAME",
        dimension_numbers=("NHWC", "HWIO", "NHWC"),
        precision=lax.Precision.HIGHEST)
    return y + b


def residual_layer_ref(x_nhwc, params):
    out = _conv_ref(x_nhwc, params["w0"], params["b0"])
    out = lax.reduce_window(out, -jnp.inf, lax.max,
                            (1, 3, 3, 1), (1, 2, 2, 1),
                            padding=((0, 0), (1, 1), (1, 1), (0, 0)))
    for blk in ("rb1", "rb2"):
        identity = out
        h = _conv_ref(jnp.maximum(out, 0.0), params[blk]["w1"], params[blk]["b1"])
        out = _conv_ref(jnp.maximum(h, 0.0), params[blk]["w2"], params[blk]["b2"]) + identity
    return out


# ----------------------------------------------------------------------------
def init_params(key, cin, cout):
    ks = jax.random.split(key, 10)
    def w(k, ci, co):
        return jax.random.normal(k, (3, 3, ci, co), jnp.float32) * 0.05
    def b(k, co):
        return jax.random.normal(k, (co,), jnp.float32) * 0.05
    return {
        "w0": w(ks[0], cin, cout), "b0": b(ks[1], cout),
        "rb1": {"w1": w(ks[2], cout, cout), "b1": b(ks[3], cout),
                "w2": w(ks[4], cout, cout), "b2": b(ks[5], cout)},
        "rb2": {"w1": w(ks[6], cout, cout), "b1": b(ks[7], cout),
                "w2": w(ks[8], cout, cout), "b2": b(ks[9], cout)},
    }


if __name__ == "__main__":
    N, Cin, Cout, H, W = 2, 4, 8, 16, 16
    key = jax.random.PRNGKey(0)
    kx, kp = jax.random.split(key)

    # PyTorch-convention NCHW input, transposed to NHWC for the kernel (glue).
    x_nchw = jax.random.normal(kx, (N, Cin, H, W), jnp.float32)
    x_nhwc = jnp.transpose(x_nchw, (0, 2, 3, 1))

    params = init_params(kp, Cin, Cout)

    out = jax.jit(residual_layer_forward)(x_nhwc, params)
    out = jax.block_until_ready(out)

    expected_shape = (N, (H - 1) // 2 + 1, (W - 1) // 2 + 1, Cout)
    assert out.shape == expected_shape, (out.shape, expected_shape)

    ref = jax.block_until_ready(residual_layer_ref(x_nhwc, params))
    err = float(jnp.max(jnp.abs(out - ref)))
    assert jnp.allclose(out, ref, atol=2e-3, rtol=2e-3), err

    print("KERNEL_OK")
</pallas_src>

<mosaic_0001>
module attributes {stable_mosaic.version = 11 : i64} {
  func.func @_fused_residual_layer_kernel(%arg0: i32, %arg1: memref<1x16x64xf32, #tpu.memory_space<vmem>>, %arg2: memref<3x64x128xf32, #tpu.memory_space<vmem>>, %arg3: memref<1x128xf32, #tpu.memory_space<vmem>>, %arg4: memref<8x16xf32, #tpu.memory_space<vmem>>, %arg5: memref<3x128x64xf32, #tpu.memory_space<vmem>>, %arg6: memref<4x3x64x64xf32, #tpu.memory_space<vmem>>, %arg7: memref<4x1x64xf32, #tpu.memory_space<vmem>>, %arg8: memref<1x8x64xf32, #tpu.memory_space<vmem>>) attributes {dimension_semantics = [#tpu.dimension_semantics<parallel>], iteration_bounds = array<i64: 2>, scalar_prefetch = 0 : i64, scratch_operands = 0 : i64, tpu.core_type = #tpu.core_type<tc>, window_params = [{transform_indices = @transform_0, window_bounds = array<i64: 1, 16, 64>}, {pipeline_mode = #tpu.pipeline_mode<synchronous>, transform_indices = @transform_1, window_bounds = array<i64: 3, 64, 128>}, {pipeline_mode = #tpu.pipeline_mode<synchronous>, transform_indices = @transform_2, window_bounds = array<i64: 1, 128>}, {pipeline_mode = #tpu.pipeline_mode<synchronous>, transform_indices = @transform_3, window_bounds = array<i64: 8, 16>}, {pipeline_mode = #tpu.pipeline_mode<synchronous>, transform_indices = @transform_4, window_bounds = array<i64: 3, 128, 64>}, {pipeline_mode = #tpu.pipeline_mode<synchronous>, transform_indices = @transform_5, window_bounds = array<i64: 4, 3, 64, 64>}, {pipeline_mode = #tpu.pipeline_mode<synchronous>, transform_indices = @transform_6, window_bounds = array<i64: 4, 1, 64>}, {transform_indices = @transform_7, window_bounds = array<i64: 1, 8, 64>}]} {
    %c0 = arith.constant 0 : index
    %c0_0 = arith.constant 0 : index
    %c0_1 = arith.constant 0 : index
    %0 = vector.load %arg1[%c0, %c0_0, %c0_1] : memref<1x16x64xf32, #tpu.memory_space<vmem>>, vector<1x16x64xf32>
    %1 = vector.shape_cast %0 : vector<1x16x64xf32> to vector<16x64xf32>
    %cst = arith.constant 0.000000e+00 : f32
    %2 = vector.broadcast %cst : f32 to vector<1x64xf32>
    %3 = tpu.concatenate %2, %1, %2 in 0 : vector<1x64xf32>, vector<16x64xf32>, vector<1x64xf32> -> vector<18x64xf32>
    %c0_2 = arith.constant 0 : index
    %c0_3 = arith.constant 0 : index
    %4 = vector.load %arg3[%c0_2, %c0_3] : memref<1x128xf32, #tpu.memory_space<vmem>>, vector<1x128xf32>
    %5 = vector.shape_cast %4 : vector<1x128xf32> to vector<1x128xf32>
    %6 = vector.broadcast %5 : vector<1x128xf32> to vector<16x128xf32>
    %7 = vector.extract_strided_slice %3 {offsets = [0, 0], sizes = [16, 64], strides = [1, 1]} : vector<18x64xf32> to vector<16x64xf32>
    %c0_4 = arith.constant 0 : index
    %c0_5 = arith.constant 0 : index
    %c0_6 = arith.constant 0 : index
    %8 = vector.load %arg2[%c0_4, %c0_5, %c0_6] : memref<3x64x128xf32, #tpu.memory_space<vmem>>, vector<1x64x128xf32>
    %9 = vector.shape_cast %8 : vector<1x64x128xf32> to vector<64x128xf32>
    %cst_7 = arith.constant dense<0.000000e+00> : vector<16x128xf32>
    %10 = tpu.matmul %7, %9, %cst_7 {dimension_numbers = #tpu.dot_dimension_numbers<[1], [0], [0], [1], [0, 0, 1, 1], [], []>} : vector<16x64xf32>, vector<64x128xf32>, vector<16x128xf32> -> vector<16x128xf32>
    %11 = arith.addf %6, %10 : vector<16x128xf32>
    %12 = vector.extract_strided_slice %3 {offsets = [1, 0], sizes = [16, 64], strides = [1, 1]} : vector<18x64xf32> to vector<16x64xf32>
    %c1 = arith.constant 1 : index
    %c0_8 = arith.constant 0 : index
    %c0_9 = arith.constant 0 : index
    %13 = vector.load %arg2[%c1, %c0_8, %c0_9] : memref<3x64x128xf32, #tpu.memory_space<vmem>>, vector<1x64x128xf32>
    %14 = vector.shape_cast %13 : vector<1x64x128xf32> to vector<64x128xf32>
    %cst_10 = arith.constant dense<0.000000e+00> : vector<16x128xf32>
    %15 = tpu.matmul %12, %14, %cst_10 {dimension_numbers = #tpu.dot_dimension_numbers<[1], [0], [0], [1], [0, 0, 1, 1], [], []>} : vector<16x64xf32>, vector<64x128xf32>, vector<16x128xf32> -> vector<16x128xf32>
    %16 = arith.addf %11, %15 : vector<16x128xf32>
    %17 = vector.extract_strided_slice %3 {offsets = [2, 0], sizes = [16, 64], strides = [1, 1]} : vector<18x64xf32> to vector<16x64xf32>
    %c2 = arith.constant 2 : index
    %c0_11 = arith.constant 0 : index
    %c0_12 = arith.constant 0 : index
    %18 = vector.load %arg2[%c2, %c0_11, %c0_12] : memref<3x64x128xf32, #tpu.memory_space<vmem>>, vector<1x64x128xf32>
    %19 = vector.shape_cast %18 : vector<1x64x128xf32> to vector<64x128xf32>
    %cst_13 = arith.constant dense<0.000000e+00> : vector<16x128xf32>
    %20 = tpu.matmul %17, %19, %cst_13 {dimension_numbers = #tpu.dot_dimension_numbers<[1], [0], [0], [1], [0, 0, 1, 1], [], []>} : vector<16x64xf32>, vector<64x128xf32>, vector<16x128xf32> -> vector<16x128xf32>
    %21 = arith.addf %16, %20 : vector<16x128xf32>
    %22 = vector.extract_strided_slice %21 {offsets = [1, 0], sizes = [15, 128], strides = [1, 1]} : vector<16x128xf32> to vector<15x128xf32>
    %23 = vector.extract_strided_slice %21 {offsets = [15, 0], sizes = [1, 128], strides = [1, 1]} : vector<16x128xf32> to vector<1x128xf32>
    %24 = tpu.concatenate %22, %23 in 0 : vector<15x128xf32>, vector<1x128xf32> -> vector<16x128xf32>
    %25 = vector.extract_strided_slice %21 {offsets = [0, 0], sizes = [1, 128], strides = [1, 1]} : vector<16x128xf32> to vector<1x128xf32>
    %26 = vector.extract_strided_slice %21 {offsets = [0, 0], sizes = [15, 128], strides = [1, 1]} : vector<16x128xf32> to vector<15x128xf32>
    %27 = tpu.concatenate %25, %26 in 0 : vector<1x128xf32>, vector<15x128xf32> -> vector<16x128xf32>
    %28 = arith.maximumf %24, %27 : vector<16x128xf32>
    %29 = arith.maximumf %21, %28 : vector<16x128xf32>
    %c0_14 = arith.constant 0 : index
    %c0_15 = arith.constant 0 : index
    %30 = vector.load %arg4[%c0_14, %c0_15] : memref<8x16xf32, #tpu.memory_space<vmem>>, vector<8x16xf32>
    %cst_16 = arith.constant dense<0.000000e+00> : vector<8x128xf32>
    %31 = tpu.matmul %30, %29, %cst_16 {dimension_numbers = #tpu.dot_dimension_numbers<[1], [0], [0], [1], [0, 0, 1, 1], [], []>} : vector<8x16xf32>, vector<16x128xf32>, vector<8x128xf32> -> vector<8x128xf32>
    %c0_17 = arith.constant 0 : index
    %c0_18 = arith.constant 0 : index
    %c0_19 = arith.constant 0 : index
    %32 = vector.load %arg5[%c0_17, %c0_18, %c0_19] : memref<3x128x64xf32, #tpu.memory_space<vmem>>, vector<1x128x64xf32>
    %33 = vector.shape_cast %32 : vector<1x128x64xf32> to vector<128x64xf32>
    %cst_20 = arith.constant dense<0.000000e+00> : vector<8x64xf32>
    %34 = tpu.matmul %31, %33, %cst_20 {dimension_numbers = #tpu.dot_dimension_numbers<[1], [0], [0], [1], [0, 0, 1, 1], [], []>} : vector<8x128xf32>, vector<128x64xf32>, vector<8x64xf32> -> vector<8x64xf32>
    %c1_21 = arith.constant 1 : index
    %c0_22 = arith.constant 0 : index
    %c0_23 = arith.constant 0 : index
    %35 = vector.load %arg5[%c1_21, %c0_22, %c0_23] : memref<3x128x64xf32, #tpu.memory_space<vmem>>, vector<1x128x64xf32>
    %36 = vector.shape_cast %35 : vector<1x128x64xf32> to vector<128x64xf32>
    %cst_24 = arith.constant dense<0.000000e+00> : vector<8x64xf32>
    %37 = tpu.matmul %31, %36, %cst_24 {dimension_numbers = #tpu.dot_dimension_numbers<[1], [0], [0], [1], [0, 0, 1, 1], [], []>} : vector<8x128xf32>, vector<128x64xf32>, vector<8x64xf32> -> vector<8x64xf32>
    %c2_25 = arith.constant 2 : index
    %c0_26 = arith.constant 0 : index
    %c0_27 = arith.constant 0 : index
    %38 = vector.load %arg5[%c2_25, %c0_26, %c0_27] : memref<3x128x64xf32, #tpu.memory_space<vmem>>, vector<1x128x64xf32>
    %39 = vector.shape_cast %38 : vector<1x128x64xf32> to vector<128x64xf32>
    %cst_28 = arith.constant dense<0.000000e+00> : vector<8x64xf32>
    %40 = tpu.matmul %31, %39, %cst_28 {dimension_numbers = #tpu.dot_dimension_numbers<[1], [0], [0], [1], [0, 0, 1, 1], [], []>} : vector<8x128xf32>, vector<128x64xf32>, vector<8x64xf32> -> vector<8x64xf32>
    %41 = arith.maximumf %37, %40 : vector<8x64xf32>
    %42 = arith.maximumf %34, %41 : vector<8x64xf32>
    %cst_29 = arith.constant 0.000000e+00 : f32
    %43 = vector.broadcast %cst_29 : f32 to vector<1x64xf32>
    %cst_30 = arith.constant 0.000000e+00 : f32
    %44 = vector.broadcast %cst_30 : f32 to vector<8x64xf32>
    %45 = arith.maximumf %42, %44 : vector<8x64xf32>
    %46 = tpu.concatenate %43, %45, %43 in 0 : vector<1x64xf32>, vector<8x64xf32>, vector<1x64xf32> -> vector<10x64xf32>
    %c0_31 = arith.constant 0 : index
    %c0_32 = arith.constant 0 : index
    %c0_33 = arith.constant 0 : index
    %47 = vector.load %arg7[%c0_31, %c0_32, %c0_33] : memref<4x1x64xf32, #tpu.memory_space<vmem>>, vector<1x1x64xf32>
    %48 = vector.shape_cast %47 : vector<1x1x64xf32> to vector<1x64xf32>
    %49 = vector.shape_cast %48 : vector<1x64xf32> to vector<1x64xf32>
    %50 = vector.broadcast %49 : vector<1x64xf32> to vector<8x64xf32>
    %51 = vector.extract_strided_slice %46 {offsets = [0, 0], sizes = [8, 64], strides = [1, 1]} : vector<10x64xf32> to vector<8x64xf32>
    %c0_34 = arith.constant 0 : index
    %c0_35 = arith.constant 0 : index
    %c0_36 = arith.constant 0 : index
    %c0_37 = arith.constant 0 : index
    %52 = vector.load %arg6[%c0_34, %c0_35, %c0_36, %c0_37] : memref<4x3x64x64xf32, #tpu.memory_space<vmem>>, vector<1x1x64x64xf32>
    %53 = vector.shape_cast %52 : vector<1x1x64x64xf32> to vector<64x64xf32>
    %cst_38 = arith.constant dense<0.000000e+00> : vector<8x64xf32>
    %54 = tpu.matmul %51, %53, %cst_38 {dimension_numbers = #tpu.dot_dimension_numbers<[1], [0], [0], [1], [0, 0, 1, 1], [], []>} : vector<8x64xf32>, vector<64x64xf32>, vector<8x64xf32> -> vector<8x64xf32>
    %55 = arith.addf %50, %54 : vector<8x64xf32>
    %56 = vector.extract_strided_slice %46 {offsets = [1, 0], sizes = [8, 64], strides = [1, 1]} : vector<10x64xf32> to vector<8x64xf32>
    %c0_39 = arith.constant 0 : index
    %c1_40 = arith.constant 1 : index
    %c0_41 = arith.constant 0 : index
    %c0_42 = arith.constant 0 : index
    %57 = vector.load %arg6[%c0_39, %c1_40, %c0_41, %c0_42] : memref<4x3x64x64xf32, #tpu.memory_space<vmem>>, vector<1x1x64x64xf32>
    %58 = vector.shape_cast %57 : vector<1x1x64x64xf32> to vector<64x64xf32>
    %cst_43 = arith.constant dense<0.000000e+00> : vector<8x64xf32>
    %59 = tpu.matmul %56, %58, %cst_43 {dimension_numbers = #tpu.dot_dimension_numbers<[1], [0], [0], [1], [0, 0, 1, 1], [], []>} : vector<8x64xf32>, vector<64x64xf32>, vector<8x64xf32> -> vector<8x64xf32>
    %60 = arith.addf %55, %59 : vector<8x64xf32>
    %61 = vector.extract_strided_slice %46 {offsets = [2, 0], sizes = [8, 64], strides = [1, 1]} : vector<10x64xf32> to vector<8x64xf32>
    %c0_44 = arith.constant 0 : index
    %c2_45 = arith.constant 2 : index
    %c0_46 = arith.constant 0 : index
    %c0_47 = arith.constant 0 : index
    %62 = vector.load %arg6[%c0_44, %c2_45, %c0_46, %c0_47] : memref<4x3x64x64xf32, #tpu.memory_space<vmem>>, vector<1x1x64x64xf32>
    %63 = vector.shape_cast %62 : vector<1x1x64x64xf32> to vector<64x64xf32>
    %cst_48 = arith.constant dense<0.000000e+00> : vector<8x64xf32>
    %64 = tpu.matmul %61, %63, %cst_48 {dimension_numbers = #tpu.dot_dimension_numbers<[1], [0], [0], [1], [0, 0, 1, 1], [], []>} : vector<8x64xf32>, vector<64x64xf32>, vector<8x64xf32> -> vector<8x64xf32>
    %65 = arith.addf %60, %64 : vector<8x64xf32>
    %cst_49 = arith.constant 0.000000e+00 : f32
    %66 = vector.broadcast %cst_49 : f32 to vector<8x64xf32>
    %67 = arith.maximumf %65, %66 : vector<8x64xf32>
    %68 = tpu.concatenate %43, %67, %43 in 0 : vector<1x64xf32>, vector<8x64xf32>, vector<1x64xf32> -> vector<10x64xf32>
    %c1_50 = arith.constant 1 : index
    %c0_51 = arith.constant 0 : index
    %c0_52 = arith.constant 0 : index
    %69 = vector.load %arg7[%c1_50, %c0_51, %c0_52] : memref<4x1x64xf32, #tpu.memory_space<vmem>>, vector<1x1x64xf32>
    %70 = vector.shape_cast %69 : vector<1x1x64xf32> to vector<1x64xf32>
    %71 = vector.shape_cast %70 : vector<1x64xf32> to vector<1x64xf32>
    %72 = vector.broadcast %71 : vector<1x64xf32> to vector<8x64xf32>
    %73 = vector.extract_strided_slice %68 {offsets = [0, 0], sizes = [8, 64], strides = [1, 1]} : vector<10x64xf32> to vector<8x64xf32>
    %c1_53 = arith.constant 1 : index
    %c0_54 = arith.constant 0 : index
    %c0_55 = arith.constant 0 : index
    %c0_56 = arith.constant 0 : index
    %74 = vector.load %arg6[%c1_53, %c0_54, %c0_55, %c0_56] : memref<4x3x64x64xf32, #tpu.memory_space<vmem>>, vector<1x1x64x64xf32>
    %75 = vector.shape_cast %74 : vector<1x1x64x64xf32> to vector<64x64xf32>
    %cst_57 = arith.constant dense<0.000000e+00> : vector<8x64xf32>
    %76 = tpu.matmul %73, %75, %cst_57 {dimension_numbers = #tpu.dot_dimension_numbers<[1], [0], [0], [1], [0, 0, 1, 1], [], []>} : vector<8x64xf32>, vector<64x64xf32>, vector<8x64xf32> -> vector<8x64xf32>
    %77 = arith.addf %72, %76 : vector<8x64xf32>
    %78 = vector.extract_strided_slice %68 {offsets = [1, 0], sizes = [8, 64], strides = [1, 1]} : vector<10x64xf32> to vector<8x64xf32>
    %c1_58 = arith.constant 1 : index
    %c1_59 = arith.constant 1 : index
    %c0_60 = arith.constant 0 : index
    %c0_61 = arith.constant 0 : index
    %79 = vector.load %arg6[%c1_58, %c1_59, %c0_60, %c0_61] : memref<4x3x64x64xf32, #tpu.memory_space<vmem>>, vector<1x1x64x64xf32>
    %80 = vector.shape_cast %79 : vector<1x1x64x64xf32> to vector<64x64xf32>
    %cst_62 = arith.constant dense<0.000000e+00> : vector<8x64xf32>
    %81 = tpu.matmul %78, %80, %cst_62 {dimension_numbers = #tpu.dot_dimension_numbers<[1], [0], [0], [1], [0, 0, 1, 1], [], []>} : vector<8x64xf32>, vector<64x64xf32>, vector<8x64xf32> -> vector<8x64xf32>
    %82 = arith.addf %77, %81 : vector<8x64xf32>
    %83 = vector.extract_strided_slice %68 {offsets = [2, 0], sizes = [8, 64], strides = [1, 1]} : vector<10x64xf32> to vector<8x64xf32>
    %c1_63 = arith.constant 1 : index
    %c2_64 = arith.constant 2 : index
    %c0_65 = arith.constant 0 : index
    %c0_66 = arith.constant 0 : index
    %84 = vector.load %arg6[%c1_63, %c2_64, %c0_65, %c0_66] : memref<4x3x64x64xf32, #tpu.memory_space<vmem>>, vector<1x1x64x64xf32>
    %85 = vector.shape_cast %84 : vector<1x1x64x64xf32> to vector<64x64xf32>
    %cst_67 = arith.constant dense<0.000000e+00> : vector<8x64xf32>
    %86 = tpu.matmul %83, %85, %cst_67 {dimension_numbers = #tpu.dot_dimension_numbers<[1], [0], [0], [1], [0, 0, 1, 1], [], []>} : vector<8x64xf32>, vector<64x64xf32>, vector<8x64xf32> -> vector<8x64xf32>
    %87 = arith.addf %82, %86 : vector<8x64xf32>
    %88 = arith.addf %42, %87 : vector<8x64xf32>
    %cst_68 = arith.constant 0.000000e+00 : f32
    %89 = vector.broadcast %cst_68 : f32 to vector<8x64xf32>
    %90 = arith.maximumf %88, %89 : vector<8x64xf32>
    %91 = tpu.concatenate %43, %90, %43 in 0 : vector<1x64xf32>, vector<8x64xf32>, vector<1x64xf32> -> vector<10x64xf32>
    %c2_69 = arith.constant 2 : index
    %c0_70 = arith.constant 0 : index
    %c0_71 = arith.constant 0 : index
    %92 = vector.load %arg7[%c2_69, %c0_70, %c0_71] : memref<4x1x64xf32, #tpu.memory_space<vmem>>, vector<1x1x64xf32>
    %93 = vector.shape_cast %92 : vector<1x1x64xf32> to vector<1x64xf32>
    %94 = vector.shape_cast %93 : vector<1x64xf32> to vector<1x64xf32>
    %95 = vector.broadcast %94 : vector<1x64xf32> to vector<8x64xf32>
    %96 = vector.extract_strided_slice %91 {offsets = [0, 0], sizes = [8, 64], strides = [1, 1]} : vector<10x64xf32> to vector<8x64xf32>
    %c2_72 = arith.constant 2 : index
    %c0_73 = arith.constant 0 : index
    %c0_74 = arith.constant 0 : index
    %c0_75 = arith.constant 0 : index
    %97 = vector.load %arg6[%c2_72, %c0_73, %c0_74, %c0_75] : memref<4x3x64x64xf32, #tpu.memory_space<vmem>>, vector<1x1x64x64xf32>
    %98 = vector.shape_cast %97 : vector<1x1x64x64xf32> to vector<64x64xf32>
    %cst_76 = arith.constant dense<0.000000e+00> : vector<8x64xf32>
    %99 = tpu.matmul %96, %98, %cst_76 {dimension_numbers = #tpu.dot_dimension_numbers<[1], [0], [0], [1], [0, 0, 1, 1], [], []>} : vector<8x64xf32>, vector<64x64xf32>, vector<8x64xf32> -> vector<8x64xf32>
    %100 = arith.addf %95, %99 : vector<8x64xf32>
    %101 = vector.extract_strided_slice %91 {offsets = [1, 0], sizes = [8, 64], strides = [1, 1]} : vector<10x64xf32> to vector<8x64xf32>
    %c2_77 = arith.constant 2 : index
    %c1_78 = arith.constant 1 : index
    %c0_79 = arith.constant 0 : index
    %c0_80 = arith.constant 0 : index
    %102 = vector.load %arg6[%c2_77, %c1_78, %c0_79, %c0_80] : memref<4x3x64x64xf32, #tpu.memory_space<vmem>>, vector<1x1x64x64xf32>
    %103 = vector.shape_cast %102 : vector<1x1x64x64xf32> to vector<64x64xf32>
    %cst_81 = arith.constant dense<0.000000e+00> : vector<8x64xf32>
    %104 = tpu.matmul %101, %103, %cst_81 {dimension_numbers = #tpu.dot_dimension_numbers<[1], [0], [0], [1], [0, 0, 1, 1], [], []>} : vector<8x64xf32>, vector<64x64xf32>, vector<8x64xf32> -> vector<8x64xf32>
    %105 = arith.addf %100, %104 : vector<8x64xf32>
    %106 = vector.extract_strided_slice %91 {offsets = [2, 0], sizes = [8, 64], strides = [1, 1]} : vector<10x64xf32> to vector<8x64xf32>
    %c2_82 = arith.constant 2 : index
    %c2_83 = arith.constant 2 : index
    %c0_84 = arith.constant 0 : index
    %c0_85 = arith.constant 0 : index
    %107 = vector.load %arg6[%c2_82, %c2_83, %c0_84, %c0_85] : memref<4x3x64x64xf32, #tpu.memory_space<vmem>>, vector<1x1x64x64xf32>
    %108 = vector.shape_cast %107 : vector<1x1x64x64xf32> to vector<64x64xf32>
    %cst_86 = arith.constant dense<0.000000e+00> : vector<8x64xf32>
    %109 = tpu.matmul %106, %108, %cst_86 {dimension_numbers = #tpu.dot_dimension_numbers<[1], [0], [0], [1], [0, 0, 1, 1], [], []>} : vector<8x64xf32>, vector<64x64xf32>, vector<8x64xf32> -> vector<8x64xf32>
    %110 = arith.addf %105, %109 : vector<8x64xf32>
    %cst_87 = arith.constant 0.000000e+00 : f32
    %111 = vector.broadcast %cst_87 : f32 to vector<8x64xf32>
    %112 = arith.maximumf %110, %111 : vector<8x64xf32>
    %113 = tpu.concatenate %43, %112, %43 in 0 : vector<1x64xf32>, vector<8x64xf32>, vector<1x64xf32> -> vector<10x64xf32>
    %c3 = arith.constant 3 : index
    %c0_88 = arith.constant 0 : index
    %c0_89 = arith.constant 0 : index
    %114 = vector.load %arg7[%c3, %c0_88, %c0_89] : memref<4x1x64xf32, #tpu.memory_space<vmem>>, vector<1x1x64xf32>
    %115 = vector.shape_cast %114 : vector<1x1x64xf32> to vector<1x64xf32>
    %116 = vector.shape_cast %115 : vector<1x64xf32> to vector<1x64xf32>
    %117 = vector.broadcast %116 : vector<1x64xf32> to vector<8x64xf32>
    %118 = vector.extract_strided_slice %113 {offsets = [0, 0], sizes = [8, 64], strides = [1, 1]} : vector<10x64xf32> to vector<8x64xf32>
    %c3_90 = arith.constant 3 : index
    %c0_91 = arith.constant 0 : index
    %c0_92 = arith.constant 0 : index
    %c0_93 = arith.constant 0 : index
    %119 = vector.load %arg6[%c3_90, %c0_91, %c0_92, %c0_93] : memref<4x3x64x64xf32, #tpu.memory_space<vmem>>, vector<1x1x64x64xf32>
    %120 = vector.shape_cast %119 : vector<1x1x64x64xf32> to vector<64x64xf32>
    %cst_94 = arith.constant dense<0.000000e+00> : vector<8x64xf32>
    %121 = tpu.matmul %118, %120, %cst_94 {dimension_numbers = #tpu.dot_dimension_numbers<[1], [0], [0], [1], [0, 0, 1, 1], [], []>} : vector<8x64xf32>, vector<64x64xf32>, vector<8x64xf32> -> vector<8x64xf32>
    %122 = arith.addf %117, %121 : vector<8x64xf32>
    %123 = vector.extract_strided_slice %113 {offsets = [1, 0], sizes = [8, 64], strides = [1, 1]} : vector<10x64xf32> to vector<8x64xf32>
    %c3_95 = arith.constant 3 : index
    %c1_96 = arith.constant 1 : index
    %c0_97 = arith.constant 0 : index
    %c0_98 = arith.constant 0 : index
    %124 = vector.load %arg6[%c3_95, %c1_96, %c0_97, %c0_98] : memref<4x3x64x64xf32, #tpu.memory_space<vmem>>, vector<1x1x64x64xf32>
    %125 = vector.shape_cast %124 : vector<1x1x64x64xf32> to vector<64x64xf32>
    %cst_99 = arith.constant dense<0.000000e+00> : vector<8x64xf32>
    %126 = tpu.matmul %123, %125, %cst_99 {dimension_numbers = #tpu.dot_dimension_numbers<[1], [0], [0], [1], [0, 0, 1, 1], [], []>} : vector<8x64xf32>, vector<64x64xf32>, vector<8x64xf32> -> vector<8x64xf32>
    %127 = arith.addf %122, %126 : vector<8x64xf32>
    %128 = vector.extract_strided_slice %113 {offsets = [2, 0], sizes = [8, 64], strides = [1, 1]} : vector<10x64xf32> to vector<8x64xf32>
    %c3_100 = arith.constant 3 : index
    %c2_101 = arith.constant 2 : index
    %c0_102 = arith.constant 0 : index
    %c0_103 = arith.constant 0 : index
    %129 = vector.load %arg6[%c3_100, %c2_101, %c0_102, %c0_103] : memref<4x3x64x64xf32, #tpu.memory_space<vmem>>, vector<1x1x64x64xf32>
    %130 = vector.shape_cast %129 : vector<1x1x64x64xf32> to vector<64x64xf32>
    %cst_104 = arith.constant dense<0.000000e+00> : vector<8x64xf32>
    %131 = tpu.matmul %128, %130, %cst_104 {dimension_numbers = #tpu.dot_dimension_numbers<[1], [0], [0], [1], [0, 0, 1, 1], [], []>} : vector<8x64xf32>, vector<64x64xf32>, vector<8x64xf32> -> vector<8x64xf32>
    %132 = arith.addf %127, %131 : vector<8x64xf32>
    %133 = arith.addf %88, %132 : vector<8x64xf32>
    %c0_105 = arith.constant 0 : index
    %c0_106 = arith.constant 0 : index
    %c0_107 = arith.constant 0 : index
    %134 = vector.load %arg8[%c0_105, %c0_106, %c0_107] : memref<1x8x64xf32, #tpu.memory_space<vmem>>, vector<1x8x64xf32>
    %135 = vector.shape_cast %134 : vector<1x8x64xf32> to vector<8x64xf32>
    %136 = vector.shape_cast %133 : vector<8x64xf32> to vector<1x8x64xf32>
    tpu.vector_store %arg8[%c0_105, %c0_106, %c0_107], %136 {strides = array<i32>} : memref<1x8x64xf32, #tpu.memory_space<vmem>>, vector<1x8x64xf32>,
    return
  }
  func.func @transform_0(%arg0: i32) -> (i32, i32, i32) {
    %c0_i32 = arith.constant 0 : i32
    %c0_i32_0 = arith.constant 0 : i32
    %c0_i32_1 = arith.constant 0 : i32
    return %arg0, %c0_i32, %c0_i32_0 : i32, i32, i32
  }
  func.func @transform_1(%arg0: i32) -> (i32, i32, i32) {
    %c0_i32 = arith.constant 0 : i32
    %c0_i32_0 = arith.constant 0 : i32
    %c0_i32_1 = arith.constant 0 : i32
    %c0_i32_2 = arith.constant 0 : i32
    return %c0_i32, %c0_i32_0, %c0_i32_1 : i32, i32, i32
  }
  func.func @transform_2(%arg0: i32) -> (i32, i32) {
    %c0_i32 = arith.constant 0 : i32
    %c0_i32_0 = arith.constant 0 : i32
    %c0_i32_1 = arith.constant 0 : i32
    return %c0_i32, %c0_i32_0 : i32, i32
  }
  func.func @transform_3(%arg0: i32) -> (i32, i32) {
    %c0_i32 = arith.constant 0 : i32
    %c0_i32_0 = arith.constant 0 : i32
    %c0_i32_1 = arith.constant 0 : i32
    return %c0_i32, %c0_i32_0 : i32, i32
  }
  func.func @transform_4(%arg0: i32) -> (i32, i32, i32) {
    %c0_i32 = arith.constant 0 : i32
    %c0_i32_0 = arith.constant 0 : i32
    %c0_i32_1 = arith.constant 0 : i32
    %c0_i32_2 = arith.constant 0 : i32
    return %c0_i32, %c0_i32_0, %c0_i32_1 : i32, i32, i32
  }
  func.func @transform_5(%arg0: i32) -> (i32, i32, i32, i32) {
    %c0_i32 = arith.constant 0 : i32
    %c0_i32_0 = arith.constant 0 : i32
    %c0_i32_1 = arith.constant 0 : i32
    %c0_i32_2 = arith.constant 0 : i32
    %c0_i32_3 = arith.constant 0 : i32
    return %c0_i32, %c0_i32_0, %c0_i32_1, %c0_i32_2 : i32, i32, i32, i32
  }
  func.func @transform_6(%arg0: i32) -> (i32, i32, i32) {
    %c0_i32 = arith.constant 0 : i32
    %c0_i32_0 = arith.constant 0 : i32
    %c0_i32_1 = arith.constant 0 : i32
    %c0_i32_2 = arith.constant 0 : i32
    return %c0_i32, %c0_i32_0, %c0_i32_1 : i32, i32, i32
  }
  func.func @transform_7(%arg0: i32) -> (i32, i32, i32) {
    %c0_i32 = arith.constant 0 : i32
    %c0_i32_0 = arith.constant 0 : i32
    %c0_i32_1 = arith.constant 0 : i32
    return %arg0, %c0_i32, %c0_i32_0 : i32, i32, i32
  }
}

</mosaic_0001>

<bundles_post_ra>
// kernel: tile.28
= control target key start
LH: loop header
LB: loop body
LE: loop exit
PB: predicated region body
PF: predicated region fallthrough
CT: control target
= control target key end

     0   :  { %s28_s0 = inlined_call_operand.vmem [shape: f32[8], index: 0, kind: input, shape index: {}]   ;;  %s29_s1 = inlined_call_operand.vmem [shape: f32[16,8], index: 1, kind: output, shape index: {}]  }
   0x1   :  { %v4_v0 = vld [vmem:[%s28_s0] ss:$0 sm:$0xff] }
   0x2   :  { %5 = vst [vmem:[%s29_s1] sm:$0xff] %v4_v0 }
   0x3   :  { %8 = vst [vmem:[%s29_s1 + $0x8] sm:$0xff] %v4_v0 }

// kernel: tile.29
= control target key start
LH: loop header
LB: loop body
LE: loop exit
PB: predicated region body
PF: predicated region fallthrough
CT: control target
= control target key end

     0   :  { %s131_s10 = smov 120   ;;  %s132_s11 = smov 104   ;;  %vm3_vm0 = vcmask 64512   ;;  %vm9_vm1 = vcmask 1048512   ;;  %vm15_vm2 = vcmask 982912   ;;  %vm21_vm3 = vcmask 917312   ;;  %s207_s0 = inlined_call_operand.vmem [shape: f32[16,8], index: 0, kind: input, shape index: {}]   ;;  %s208_s1 = inlined_call_operand.vmem [shape: f32[1,128], index: 1, kind: output, shape index: {}]  }
   0x1   :  { %v101_v0 = vld [vmem:[%s207_s0 + $0xf] sm:$0x1]   ;;  %v103_v1 = vld [vmem:[%s207_s0 + $0xd] sm:$0x1]   ;;  %v105_v2 = vld [vmem:[%s207_s0 + $0xb] sm:$0x1]  }
   0x2   :  { %7 = vrot.lane.b32.xlu0 %v101_v0, %s131_s10  ;;  %19 = vrot.lane.b32.xlu1 %v103_v1, %s132_s11  ;;  %s133_s14 = smov 88   ;;  %v102_v3 = vld [vmem:[%s207_s0 + $0xe] sm:$0x1]   ;;  %v104_v4 = vld [vmem:[%s207_s0 + $0xc] sm:$0x1]   ;;  %s134_s19 = smov 112  }
   0x3   :  { %31 = vrot.lane.b32.xlu2 %v105_v2, %s133_s14  ;;  %s135_s20 = smov 96   ;;  %v106_v5 = vld [vmem:[%s207_s0 + $0xa] sm:$0x1]   ;;  %s136_s23 = smov 80   ;;  %v107_v6 = vld [vmem:[%s207_s0 + $0x9] sm:$0x1]  }
   0x4   :  { %v108_v7 = vld [vmem:[%s207_s0 + $0x8] sm:$0x1]   ;;  %s137_s28 = smov 72   ;;  %s138_s29 = smov 64   ;;  %v109_v8 = vld [vmem:[%s207_s0 + $0x7] sm:$0x1]  }
   0x5   :  { %s139_s3 = smov 56   ;;  %v110_v9 = vld [vmem:[%s207_s0 + $0x6] sm:$0x1]   ;;  %v111_v10 = vld [vmem:[%s207_s0 + $0x5] sm:$0x1]   ;;  %s140_s8 = smov 48  }
   0x6   :  { %s141_s9 = smov 40   ;;  %v112_v11 = vld [vmem:[%s207_s0 + $0x4] sm:$0x1]   ;;  %s142_s12 = smov 32   ;;  %v113_v12 = vld [vmem:[%s207_s0 + $0x3] sm:$0x1]  }
   0x7   :  { %v114_v13 = vld [vmem:[%s207_s0 + $0x2] sm:$0x1]   ;;  %s143_s17 = smov 24   ;;  %s144_s18 = smov 16   ;;  %v115_v14 = vld [vmem:[%s207_s0 + $0x1] sm:$0x1]  }
   0x8   :  { %s145_s21 = smov 8   ;;  %v2_v15 = vld [vmem:[%s207_s0] sm:$0x1]   ;;  %vm27_vm4 = vcmask 851712   ;;  %vm33_vm5 = vcmask 786112   ;;  %vm39_vm6 = vcmask 720512  }
   0x9   :  { %4 = vst.msk [vmem:[#allocation0] sm:$0x1] %vm3_vm0, %v2_v15   ;;  %vm45_vm7 = vcmask 654912   ;;  %vm51_vm8 = vcmask 589312   ;;  %vm57_vm9 = vcmask 523712   ;;  %vm63_vm10 = vcmask 458112  }
   0xa   :  { %13 = vrot.lane.b32.xlu0 %v102_v3, %s134_s19  ;;  %25 = vrot.lane.b32.xlu1 %v104_v4, %s135_s20  ;;  %vm69_vm11 = vcmask 392512   ;;  %vm75_vm12 = vcmask 326912   ;;  %vm81_vm13 = vcmask 261312   ;;  %vm87_vm14 = vcmask 195712  }
   0xb   :  { %37 = vrot.lane.b32.xlu2 %v106_v5, %s136_s23  ;;  %vm93_vm15 = vcmask 130112  }
  0x12   :  { %43 = vrot.lane.b32.xlu0 %v107_v6, %s137_s28  ;;  %49 = vrot.lane.b32.xlu1 %v108_v7, %s138_s29 }
  0x13   :  { %55 = vrot.lane.b32.xlu2 %v109_v8, %s139_s3 }
  0x1a   :  { %61 = vrot.lane.b32.xlu0 %v110_v9, %s140_s8  ;;  %67 = vrot.lane.b32.xlu1 %v111_v10, %s141_s9 }
  0x1b   :  { %73 = vrot.lane.b32.xlu2 %v112_v11, %s142_s12 }
  0x22   :  { %79 = vrot.lane.b32.xlu0 %v113_v12, %s143_s17  ;;  %85 = vrot.lane.b32.xlu1 %v114_v13, %s144_s18 }
  0x23   :  { %91 = vrot.lane.b32.xlu2 %v115_v14, %s145_s21 }
  0x5d   :  { %v32_v16 = vpop.permute.xlu2 %31  }
  0x65   :  { %v38_v17 = vpop.permute.xlu2 %37  }
  0x6d   :  { %v56_v18 = vpop.permute.xlu2 %55  }
  0x74   :  { %v8_v19 = vpop.permute.xlu0 %7   ;;  %v20_v20 = vpop.permute.xlu1 %19  }
  0x75   :  { %10 = vst.msk [vmem:[#allocation0] sm:$0x1] %vm9_vm1, %v8_v19   ;;  %v74_v21 = vpop.permute.xlu2 %73  }
  0x7c   :  { %v14_v22 = vpop.permute.xlu0 %13   ;;  %v26_v23 = vpop.permute.xlu1 %25  }
  0x7d   :  { %16 = vst.msk [vmem:[#allocation0] sm:$0x1] %vm15_vm2, %v14_v22   ;;  %v92_v24 = vpop.permute.xlu2 %91  }
  0x7e   :  { %22 = vst.msk [vmem:[#allocation0] sm:$0x1] %vm21_vm3, %v20_v20  }
  0x7f   :  { %28 = vst.msk [vmem:[#allocation0] sm:$0x1] %vm27_vm4, %v26_v23  }
  0x80   :  { %34 = vst.msk [vmem:[#allocation0] sm:$0x1] %vm33_vm5, %v32_v16  }
  0x81   :  { %40 = vst.msk [vmem:[#allocation0] sm:$0x1] %vm39_vm6, %v38_v17  }
  0x84   :  { %v44_v25 = vpop.permute.xlu0 %43   ;;  %v50_v26 = vpop.permute.xlu1 %49  }
  0x85   :  { %46 = vst.msk [vmem:[#allocation0] sm:$0x1] %vm45_vm7, %v44_v25  }
  0x86   :  { %52 = vst.msk [vmem:[#allocation0] sm:$0x1] %vm51_vm8, %v50_v26  }
  0x87   :  { %58 = vst.msk [vmem:[#allocation0] sm:$0x1] %vm57_vm9, %v56_v18  }
  0x8c   :  { %v62_v27 = vpop.permute.xlu0 %61   ;;  %v68_v28 = vpop.permute.xlu1 %67  }
  0x8d   :  { %64 = vst.msk [vmem:[#allocation0] sm:$0x1] %vm63_vm10, %v62_v27  }
  0x8e   :  { %70 = vst.msk [vmem:[#allocation0] sm:$0x1] %vm69_vm11, %v68_v28  }
  0x8f   :  { %76 = vst.msk [vmem:[#allocation0] sm:$0x1] %vm75_vm12, %v74_v21  }
  0x94   :  { %v80_v29 = vpop.permute.xlu0 %79   ;;  %v86_v30 = vpop.permute.xlu1 %85  }
  0x95   :  { %82 = vst.msk [vmem:[#allocation0] sm:$0x1] %vm81_vm13, %v80_v29  }
  0x96   :  { %88 = vst.msk [vmem:[#allocation0] sm:$0x1] %vm87_vm14, %v86_v30  }
  0x97   :  { %94 = vst.msk [vmem:[#allocation0] sm:$0x1] %vm93_vm15, %v92_v24  }
  0x9e   :  { %v97_v31 = vld [vmem:[#allocation0] sm:$0x1] }
  0x9f   :  { %100 = vst [vmem:[%s208_s1] sm:$0x1] %v97_v31 }

// kernel: tile.45
= control target key start
LH: loop header
LB: loop body
LE: loop exit
PB: predicated region body
PF: predicated region fallthrough
CT: control target
= control target key end

     0   :  { %s22_s0 = inlined_call_operand.vmem [shape: f32[8], index: 0, kind: input, shape index: {}]   ;;  %s23_s1 = inlined_call_operand.vmem [shape: f32[8,8], index: 1, kind: output, shape index: {}]  }
   0x1   :  { %v4_v0 = vld [vmem:[%s22_s0] ss:$0 sm:$0xff] }
   0x2   :  { %5 = vst [vmem:[%s23_s1] sm:$0xff] %v4_v0 }

// kernel: tile.49
= control target key start
LH: loop header
LB: loop body
LE: loop exit
PB: predicated region body
PF: predicated region fallthrough
CT: control target
= control target key end

     0   :  { %s67_s10 = smov 56   ;;  %s68_s11 = smov 40   ;;  %vm3_vm0 = vcmask 64512   ;;  %vm9_vm1 = vcmask 523712   ;;  %vm15_vm2 = vcmask 458112   ;;  %vm21_vm3 = vcmask 392512   ;;  %s111_s0 = inlined_call_operand.vmem [shape: f32[8,8], index: 0, kind: input, shape index: {}]   ;;  %s112_s1 = inlined_call_operand.vmem [shape: f32[1,1,64], index: 1, kind: output, shape index: {}]  }
   0x1   :  { %v53_v0 = vld [vmem:[%s111_s0 + $0x7] sm:$0x1]   ;;  %v55_v1 = vld [vmem:[%s111_s0 + $0x5] sm:$0x1]   ;;  %v57_v2 = vld [vmem:[%s111_s0 + $0x3] sm:$0x1]  }
   0x2   :  { %7 = vrot.lane.b32.xlu0 %v53_v0, %s67_s10  ;;  %19 = vrot.lane.b32.xlu1 %v55_v1, %s68_s11  ;;  %s69_s14 = smov 24   ;;  %v54_v3 = vld [vmem:[%s111_s0 + $0x6] sm:$0x1]   ;;  %v56_v4 = vld [vmem:[%s111_s0 + $0x4] sm:$0x1]   ;;  %s70_s21 = smov 48  }
   0x3   :  { %31 = vrot.lane.b32.xlu2 %v57_v2, %s69_s14  ;;  %v58_v5 = vld [vmem:[%s111_s0 + $0x2] sm:$0x1]   ;;  %s71_s22 = smov 32   ;;  %s72_s23 = smov 16   ;;  %v59_v6 = vld [vmem:[%s111_s0 + $0x1] sm:$0x1]  }
   0x4   :  { %s73_s26 = smov 8   ;;  %v2_v7 = vld [vmem:[%s111_s0] sm:$0x1]   ;;  %vm27_vm4 = vcmask 326912   ;;  %vm33_vm5 = vcmask 261312   ;;  %vm39_vm6 = vcmask 195712  }
   0x5   :  { %4 = vst.msk [vmem:[#allocation0] sm:$0x1] %vm3_vm0, %v2_v7   ;;  %vm45_vm7 = vcmask 130112  }
   0xa   :  { %13 = vrot.lane.b32.xlu0 %v54_v3, %s70_s21  ;;  %25 = vrot.lane.b32.xlu1 %v56_v4, %s71_s22 }
   0xb   :  { %37 = vrot.lane.b32.xlu2 %v58_v5, %s72_s23 }
  0x12   :  { %43 = vrot.lane.b32.xlu0 %v59_v6, %s73_s26 }
  0x5d   :  { %v32_v8 = vpop.permute.xlu2 %31  }
  0x65   :  { %v38_v9 = vpop.permute.xlu2 %37  }
  0x74   :  { %v8_v10 = vpop.permute.xlu0 %7   ;;  %v20_v11 = vpop.permute.xlu1 %19  }
  0x75   :  { %10 = vst.msk [vmem:[#allocation0] sm:$0x1] %vm9_vm1, %v8_v10  }
  0x7c   :  { %v14_v12 = vpop.permute.xlu0 %13   ;;  %v26_v13 = vpop.permute.xlu1 %25  }
  0x7d   :  { %16 = vst.msk [vmem:[#allocation0] sm:$0x1] %vm15_vm2, %v14_v12  }
  0x7e   :  { %22 = vst.msk [vmem:[#allocation0] sm:$0x1] %vm21_vm3, %v20_v11  }
  0x7f   :  { %28 = vst.msk [vmem:[#allocation0] sm:$0x1] %vm27_vm4, %v26_v13  }
  0x80   :  { %34 = vst.msk [vmem:[#allocation0] sm:$0x1] %vm33_vm5, %v32_v8  }
  0x81   :  { %40 = vst.msk [vmem:[#allocation0] sm:$0x1] %vm39_vm6, %v38_v9  }
  0x84   :  { %v44_v14 = vpop.permute.xlu0 %43  }
  0x85   :  { %46 = vst.msk [vmem:[#allocation0] sm:$0x1] %vm45_vm7, %v44_v14  }
  0x8c   :  { %v49_v15 = vld [vmem:[#allocation0] sm:$0x1] }
  0x8d   :  { %52 = vst [vmem:[%s112_s1] sm:$0x1] %v49_v15 }

// kernel: residual_layer_forward.1
= control target key start
LH: loop header
LB: loop body
LE: loop exit
PB: predicated region body
PF: predicated region fallthrough
CT: control target
= control target key end

     0   :  { %s1320_s24 = smov 0   ;;  %s1917_s0 = inlined_call_operand.vmem [shape: f32[2,16,64], index: 0, kind: input, shape index: {}]   ;;  %s1918_s1 = inlined_call_operand.vmem [shape: f32[3,64,128], index: 1, kind: input, shape index: {}]   ;;  %s1919_s2 = inlined_call_operand.vmem [shape: f32[1,128], index: 2, kind: input, shape index: {}]   ;;  %s1920_s3 = inlined_call_operand.vmem [shape: f32[8,16], index: 3, kind: input, shape index: {}]   ;;  %s1921_s4 = inlined_call_operand.vmem [shape: f32[3,128,64], index: 4, kind: input, shape index: {}]   ;;  %s1922_s5 = inlined_call_operand.vmem [shape: f32[4,3,64,64], index: 5, kind: input, shape index: {}]   ;;  %s1923_s6 = inlined_call_operand.vmem [shape: f32[4,1,64], index: 6, kind: input, shape index: {}]   ;;  %s1924_s7 = inlined_call_operand.vmem [shape: f32[2,8,64], index: 7, kind: output, shape index: {}]  }
   0x1 LB: > { %s1090_s25 = sadd.s32 4294967295, %s1278_s24   ;;  %p1094_p0 = scmp.ge.s32.totalorder %s1278_s24, 1  ;;  %s1278_s24 = sphi %s1320_s24, %s17_s24  }
   0x2   : > { %p237_p1 = scmp.lt.s32.totalorder %s1278_s24, 3 }
   0x4   : > { %p238_p2 = pnand %p1094_p0, %p237_p1 }
   0x5   : > { %p268_p3 = scmp.lt.s32.totalorder (!%p238_p2), %s1090_s25, 1 }
   0x6   : > { %241 = sbr.rel (%p238_p2) target bundleno = 1028 (0x404), region = 48 }
   0xb   : > { %v1117_v0 = vld [vmem:[%s1918_s1 + $0xb8] sm:$0xff]  ;;  %v1116_v2 = vld [vmem:[%s1918_s1 + $0xb0] sm:$0xff]  ;;  %v1115_v5 = vld [vmem:[%s1918_s1 + $0xa8] sm:$0xff]  ;;  %s1926_s25 = smov (!%p268_p3, %s1090_s25), 1  ;;  %vm281_vm0 = vcmask 1040384   ;;  %vm386_vm1 = vcmask 1045504  }
   0xc   : > { %v300_v1 = vld [vmem:[%s1918_s1 + $0x38] sm:$0xff]  ;;  %404 = vmatpush.msra.mxu2 %v1117_v0  ;;  %v299_v3 = vld [vmem:[%s1918_s1 + $0x30] sm:$0xff]  ;;  %v298_v6 = vld [vmem:[%s1918_s1 + $0x28] sm:$0xff]  ;;  %s1258_s27 = sshll.u32 %s1926_s25, 4  ;;  %vm342_vm2 = vcmask 1046528   ;;  %vm301_vm3 = vcmask 523264  }
   0xd   : > { %315 = vmatpush.msra.mxu0 %v300_v1  ;;  %v1107_v4 = vld [vmem:[%s1918_s1 + $0x78] sm:$0xff]  ;;  %v1106_v7 = vld [vmem:[%s1918_s1 + $0x70] sm:$0xff]  ;;  %v1105_v8 = vld [vmem:[%s1918_s1 + $0x68] sm:$0xff]  ;;  %s272_s9 = scalar_lea.vmem %s1917_s0, %s1258_s27  ;;  %vm440_vm4 = vcmask 130048   ;;  %s1097_s19 = sshll.u32 %s1926_s25, 3 }
   0xe   : > { %360 = vmatpush.msra.mxu1 %v1107_v4  ;;  %405 = vmatpush.msra.mxu2 %v1116_v2  ;;  %v1114_v9 = vld [vmem:[%s1918_s1 + $0xa0] sm:$0xff]  ;;  %v1113_v12 = vld [vmem:[%s1918_s1 + $0x98] sm:$0xff]  ;;  %v1112_v14 = vld [vmem:[%s1918_s1 + $0x90] sm:$0xff]  ;;  %s276_s22 = scalar_lea.vmem %s1924_s7, %s1097_s19 }
   0xf   : > { %316 = vmatpush.msra.mxu0 %v299_v3  ;;  %v297_v10 = vld [vmem:[%s1918_s1 + $0x20] sm:$0xff]  ;;  %v296_v13 = vld [vmem:[%s1918_s1 + $0x18] sm:$0xff]  ;;  %v278_v17 = vld [vmem:[%s272_s9 + $0x8] sm:$0xff] }
  0x10   : > { %361 = vmatpush.msra.mxu1 %v1106_v7  ;;  %406 = vmatpush.msra.mxu2 %v1115_v5  ;;  %v1104_v11 = vld [vmem:[%s1918_s1 + $0x60] sm:$0xff]  ;;  %v1103_v15 = vld [vmem:[%s1918_s1 + $0x58] sm:$0xff]  ;;  %v295_v18 = vld [vmem:[%s1918_s1 + $0x10] sm:$0xff]  ;;  %v283_v21 = vrot.slane %v278_v17, 7 }
  0x11   : > { %317 = vmatpush.msra.mxu0 %v298_v6  ;;  %v277_v16 = vld [vmem:[%s272_s9] sm:$0xff]  ;;  %v1111_v19 = vld [vmem:[%s1918_s1 + $0x88] sm:$0xff]  ;;  %v1102_v22 = vld [vmem:[%s1918_s1 + $0x50] sm:$0xff] }
  0x12   : > { %362 = vmatpush.msra.mxu1 %v1105_v8  ;;  %407 = vmatpush.msra.mxu2 %v1114_v9  ;;  %v282_v20 = vrot.slane %v277_v16, 7  ;;  %v294_v23 = vld [vmem:[%s1918_s1 + $0x8] sm:$0xff]  ;;  %v1110_v31 = vld [vmem:[%s1918_s1 + $0x80] sm:$0xff]  ;;  %v288_v35 = vsel %vm281_vm0, %v283_v21, 0.0  ;;  %v1136_v41 = vld [vmem:[%s1921_s4 + $0xf8] sm:$0xff] }
  0x13   : > { %318 = vmatpush.msra.mxu0 %v297_v10  ;;  %v1101_v28 = vld [vmem:[%s1918_s1 + $0x48] sm:$0xff]  ;;  %v293_v32 = vld [vmem:[%s1918_s1] sm:$0xff]  ;;  %v390_v37 = vrot.slane %v288_v35, 2  ;;  %v346_v38 = vrot.slane %v288_v35, 1  ;;  %v1152_v42 = vld [vmem:[%s1921_s4 + $0x178] sm:$0xff] }
  0x14   : > { %363 = vmatpush.msra.mxu1 %v1104_v11  ;;  %408 = vmatpush.msra.mxu2 %v1113_v12  ;;  %v284_v24 = vsel %vm281_vm0, %v282_v20, %v283_v21  ;;  %v287_v25 = vsel %vm281_vm0, 0.0, %v282_v20  ;;  %v1100_v34 = vld [vmem:[%s1918_s1 + $0x40] sm:$0xff]  ;;  %v1135_v44 = vld [vmem:[%s1921_s4 + $0xf0] sm:$0xff]  ;;  %v1134_v47 = vld [vmem:[%s1921_s4 + $0xe8] sm:$0xff] }
  0x15   : > { %319 = vmatpush.msra.mxu0 %v296_v13  ;;  %v387_v26 = vrot.slane %v287_v25, 2  ;;  %v388_v27 = vrot.slane %v284_v24, 2  ;;  %v343_v29 = vrot.slane %v287_v25, 1  ;;  %v344_v30 = vrot.slane %v284_v24, 1  ;;  %v1267_v43 = vld [vmem:[%s1919_s2] ss:$0 sm:$0xff] }
  0x16   : > { %364 = vmatpush.msra.mxu1 %v1103_v15  ;;  %409 = vmatpush.msra.mxu2 %v1112_v14  ;;  %v1151_v45 = vld [vmem:[%s1921_s4 + $0x170] sm:$0xff]  ;;  %v1150_v48 = vld [vmem:[%s1921_s4 + $0x168] sm:$0xff]  ;;  %v1133_v51 = vld [vmem:[%s1921_s4 + $0xe0] sm:$0xff] }
  0x17   : > { %320 = vmatpush.msra.mxu0 %v295_v18  ;;  %v389_v33 = vsel %vm386_vm1, %v387_v26, %v388_v27  ;;  %v345_v36 = vsel %vm342_vm2, %v343_v29, %v344_v30  ;;  %v391_v39 = vsel %vm386_vm1, %v388_v27, %v390_v37  ;;  %v347_v40 = vsel %vm342_vm2, %v344_v30, %v346_v38  ;;  %v1149_v52 = vld [vmem:[%s1921_s4 + $0x160] sm:$0xff]  ;;  %v1132_v53 = vld [vmem:[%s1921_s4 + $0xd8] sm:$0xff]  ;;  %v1131_v57 = vld [vmem:[%s1921_s4 + $0xd0] sm:$0xff] }
  0x18   : > { %365 = vmatpush.msra.mxu1 %v1102_v22  ;;  %410 = vmatpush.msra.mxu2 %v1111_v19  ;;  %v1148_v54 = vld [vmem:[%s1921_s4 + $0x158] sm:$0xff]  ;;  %v1147_v58 = vld [vmem:[%s1921_s4 + $0x150] sm:$0xff]  ;;  %v1130_v60 = vld [vmem:[%s1921_s4 + $0xc8] sm:$0xff] }
  0x19   : > { %321 = vmatpush.msra.mxu0 %v294_v23  ;;  %v1146_v61 = vld [vmem:[%s1921_s4 + $0x148] sm:$0xff]  ;;  %v1129_v1 = vld [vmem:[%s1921_s4 + $0xc0] sm:$0xff]  ;;  %v1128_v4 = vld [vmem:[%s1921_s4 + $0xb8] sm:$0xff] }
  0x1a   : > { %366 = vmatpush.msra.mxu1 %v1101_v28  ;;  %411 = vmatpush.msra.mxu2 %v1110_v31  ;;  %v1145_v2 = vld [vmem:[%s1921_s4 + $0x140] sm:$0xff]  ;;  %v1144_v5 = vld [vmem:[%s1921_s4 + $0x138] sm:$0xff]  ;;  %v1127_v8 = vld [vmem:[%s1921_s4 + $0xb0] sm:$0xff] }
  0x1b   : > { %322 = vmatpush.msra.mxu0 %v293_v32  ;;  %1118 = vmatmul.msk.f32.vlgmr.msra.gmra.mxu2 %vm301_vm3, %v389_v33  ;;  %v1143_v9 = vld [vmem:[%s1921_s4 + $0x130] sm:$0xff]  ;;  %v1126_v11 = vld [vmem:[%s1921_s4 + $0xa8] sm:$0xff]  ;;  %v1125_v17 = vld [vmem:[%s1921_s4 + $0xa0] sm:$0xff] }
  0x1c   : > { %1098 = vmatmul.msk.f32.vlgmr.msra.gmra.mxu0 %vm301_vm3, %v287_v25  ;;  %367 = vmatpush.msra.mxu1 %v1100_v34  ;;  %v1142_v12 = vld [vmem:[%s1921_s4 + $0x128] sm:$0xff]  ;;  %v1141_v18 = vld [vmem:[%s1921_s4 + $0x120] sm:$0xff]  ;;  %v1140_v25 = vld [vmem:[%s1921_s4 + $0x118] sm:$0xff] }
  0x1d   : > { %1108 = vmatmul.msk.f32.vlgmr.msra.gmra.mxu1 %vm301_vm3, %v345_v36  ;;  %517 = vmatpush.msrb.mxu0 %v1136_v41  ;;  %v1123_v27 = vld [vmem:[%s1921_s4 + $0x90] sm:$0xff]  ;;  %v439_v30 = vld [vmem:[%s1920_s3] sm:$0xff]  ;;  %v1122_v31 = vld [vmem:[%s1921_s4 + $0x88] sm:$0xff] }
  0x1e   : > { %554 = vmatpush.msrb.mxu1 %v1152_v42  ;;  %v1139_v28 = vld [vmem:[%s1921_s4 + $0x110] sm:$0xff]  ;;  %v1138_v32 = vld [vmem:[%s1921_s4 + $0x108] sm:$0xff]  ;;  %v479_v33 = vld [vmem:[%s1921_s4 + $0x78] sm:$0xff] }
  0x1f   : > { %518 = vmatpush.msrb.mxu0 %v1135_v44  ;;  %v478_v34 = vld [vmem:[%s1921_s4 + $0x70] sm:$0xff]  ;;  %v477_v35 = vld [vmem:[%s1921_s4 + $0x68] sm:$0xff]  ;;  %v476_v36 = vld [vmem:[%s1921_s4 + $0x60] sm:$0xff] }
  0x20   : > { %555 = vmatpush.msrb.mxu1 %v1151_v45  ;;  %v475_v37 = vld [vmem:[%s1921_s4 + $0x58] sm:$0xff]  ;;  %v474_v38 = vld [vmem:[%s1921_s4 + $0x50] sm:$0xff]  ;;  %v468_v44 = vld [vmem:[%s1921_s4 + $0x20] sm:$0xff] }
  0x21   : > { %519 = vmatpush.msrb.mxu0 %v1134_v47  ;;  %v471_v41 = vld [vmem:[%s1921_s4 + $0x38] sm:$0xff]  ;;  %v470_v42 = vld [vmem:[%s1921_s4 + $0x30] sm:$0xff]  ;;  %v465_v47 = vld [vmem:[%s1921_s4 + $0x8] sm:$0xff] }
  0x22   : > { %556 = vmatpush.msrb.mxu1 %v1150_v48  ;;  %v467_v45 = vld [vmem:[%s1921_s4 + $0x18] sm:$0xff]  ;;  %v464_v48 = vld [vmem:[%s1921_s4] sm:$0xff] }
  0x23   : > { %1119 = vmatmul.msk.f32.gmra.mxu2 %vm301_vm3, %v391_v39  ;;  %520 = vmatpush.msrb.mxu0 %v1133_v51  ;;  %v473_v39 = vld [vmem:[%s1921_s4 + $0x48] sm:$0xff]  ;;  %v593_v51 = vld [vmem:[%s1922_s5 + $0x38] sm:$0xff] }
  0x24   : > { %1099 = vmatmul.msk.f32.gmra.mxu0 %vm301_vm3, %v284_v24  ;;  %557 = vmatpush.msrb.mxu1 %v1149_v52  ;;  %v1124_v24 = vld [vmem:[%s1921_s4 + $0x98] sm:$0xff]  ;;  %v592_v52 = vld [vmem:[%s1922_s5 + $0x30] sm:$0xff] }
  0x25   : > { %1109 = vmatmul.msk.f32.gmra.mxu1 %vm301_vm3, %v347_v40  ;;  %521 = vmatpush.msrb.mxu0 %v1132_v53  ;;  %v472_v40 = vld [vmem:[%s1921_s4 + $0x40] sm:$0xff]  ;;  %v591_v53 = vld [vmem:[%s1922_s5 + $0x28] sm:$0xff] }
  0x26   : > { %558 = vmatpush.msrb.mxu1 %v1148_v54  ;;  %605 = vmatpush.msrb.mxu2 %v593_v51  ;;  %v590_v54 = vld [vmem:[%s1922_s5 + $0x20] sm:$0xff] }
  0x27   : > { %522 = vmatpush.msrb.mxu0 %v1131_v57  ;;  %v588_v57 = vld [vmem:[%s1922_s5 + $0x10] sm:$0xff] }
  0x28   : > { %559 = vmatpush.msrb.mxu1 %v1147_v58  ;;  %606 = vmatpush.msrb.mxu2 %v592_v52  ;;  %v1170_v58 = vld [vmem:[%s1922_s5 + $0xb8] sm:$0xff]  ;;  %v1268_v52 = vld [vmem:[%s1923_s6] ss:$0 sm:$0xff] }
  0x29   : > { %523 = vmatpush.msrb.mxu0 %v1130_v60  ;;  %v1169_v60 = vld [vmem:[%s1922_s5 + $0xb0] sm:$0xff] }
  0x2a   : > { %560 = vmatpush.msrb.mxu1 %v1146_v61  ;;  %607 = vmatpush.msrb.mxu2 %v591_v53  ;;  %v586_v61 = vld [vmem:[%s1922_s5] sm:$0xff] }
  0x2b   : > { %524 = vmatpush.msrb.mxu0 %v1129_v1  ;;  %v1160_v1 = vld [vmem:[%s1922_s5 + $0x70] sm:$0xff] }
  0x2c   : > { %561 = vmatpush.msrb.mxu1 %v1145_v2  ;;  %608 = vmatpush.msrb.mxu2 %v590_v54  ;;  %v1166_v2 = vld [vmem:[%s1922_s5 + $0x98] sm:$0xff] }
  0x2d   : > { %525 = vmatpush.msrb.mxu0 %v1128_v4  ;;  %v1165_v4 = vld [vmem:[%s1922_s5 + $0x90] sm:$0xff] }
  0x2e   : > { %562 = vmatpush.msrb.mxu1 %v1144_v5  ;;  %v1158_v5 = vld [vmem:[%s1922_s5 + $0x60] sm:$0xff] }
  0x2f   : > { %526 = vmatpush.msrb.mxu0 %v1127_v8  ;;  %v1163_v8 = vld [vmem:[%s1922_s5 + $0x80] sm:$0xff] }
  0x30   : > { %563 = vmatpush.msrb.mxu1 %v1143_v9  ;;  %v1156_v9 = vld [vmem:[%s1922_s5 + $0x50] sm:$0xff] }
  0x31   : > { %527 = vmatpush.msrb.mxu0 %v1126_v11  ;;  %v1154_v11 = vld [vmem:[%s1922_s5 + $0x40] sm:$0xff] }
  0x32   : > { %564 = vmatpush.msrb.mxu1 %v1142_v12 }
  0x33   : > { %528 = vmatpush.msrb.mxu0 %v1125_v17 }
  0x34   : > { %565 = vmatpush.msrb.mxu1 %v1141_v18 }
  0x35   : > { %529 = vmatpush.msrb.mxu0 %v1124_v24 }
  0x36   : > { %566 = vmatpush.msrb.mxu1 %v1140_v25 }
  0x37   : > { %530 = vmatpush.msrb.mxu0 %v1123_v27  ;;  %v1180_v27 = vld [vmem:[%s1922_s5 + $0xf8] sm:$0xff] }
  0x38   : > { %567 = vmatpush.msrb.mxu1 %v1139_v28  ;;  %v1179_v28 = vld [vmem:[%s1922_s5 + $0xf0] sm:$0xff] }
  0x39   : > { %531 = vmatpush.msrb.mxu0 %v1122_v31  ;;  %v1178_v31 = vld [vmem:[%s1922_s5 + $0xe8] sm:$0xff] }
  0x3a   : > { %568 = vmatpush.msrb.mxu1 %v1138_v32  ;;  %v1188_v32 = vld [vmem:[%s1922_s5 + $0x130] sm:$0xff] }
  0x99   : > { %v324_v46 = vpop.f32.mrf.mxu0 }
  0x9a   : > { %v330_v49 = vadd.f32 %v1267_v43, %v324_v46  ;;  %v369_v50 = vpop.f32.mrf.mxu1  ;;  %v466_v46 = vld [vmem:[%s1921_s4 + $0x10] sm:$0xff] }
  0x9c   : > { %v375_v55 = vadd.f32 %v369_v50, %v330_v49  ;;  %v1121_v49 = vld [vmem:[%s1921_s4 + $0x80] sm:$0xff] }
  0x9d   : > { %v1137_v50 = vld [vmem:[%s1921_s4 + $0x100] sm:$0xff]  ;;  %532 = vmatpush.msrb.mxu0 %v1121_v49 }
  0x9e   : > { %v413_v56 = vpop.f32.mrf.mxu2  ;;  %569 = vmatpush.msrb.mxu1 %v1137_v50  ;;  %v1182_v49 = vld [vmem:[%s1922_s5 + $0x100] sm:$0xff] }
  0x9f   : > { %v419_v63 = vadd.f32 %v413_v56, %v375_v55  ;;  %v589_v56 = vld [vmem:[%s1922_s5 + $0x18] sm:$0xff]  ;;  %720 = vmatpush.msra.mxu0 %v1180_v27  ;;  %v1191_v50 = vld [vmem:[%s1922_s5 + $0x140] sm:$0xff] }
  0xa0   : > { %609 = vmatpush.msrb.mxu2 %v589_v56  ;;  %v1210_v27 = vld [vmem:[%s1922_s5 + $0x1c0] sm:$0xff] }
  0xa1   : > { %v327_v59 = vpop.f32.mrf.mxu0  ;;  %v429_v7 = vrot.slane %v419_v63, 7  ;;  %v423_v13 = vrot.slane %v419_v63, 1  ;;  %721 = vmatpush.msra.mxu0 %v1179_v28  ;;  %v1219_v28 = vld [vmem:[%s1922_s5 + $0x200] sm:$0xff] }
  0xa2   : > { %v331_v62 = vadd.f32 %v1267_v43, %v327_v59  ;;  %v372_v0 = vpop.f32.mrf.mxu1  ;;  %v469_v43 = vld [vmem:[%s1921_s4 + $0x28] sm:$0xff]  ;;  %610 = vmatpush.msrb.mxu2 %v588_v57 }
  0xa3   : > { %v434_v16 = vsel %vm281_vm0, %v419_v63, %v429_v7  ;;  %v587_v59 = vld [vmem:[%s1922_s5 + $0x8] sm:$0xff]  ;;  %722 = vmatpush.msra.mxu0 %v1178_v31 }
  0xa4   : > { %v376_v3 = vadd.f32 %v372_v0, %v331_v62  ;;  %611 = vmatpush.msrb.mxu2 %v587_v59  ;;  %v1168_v62 = vld [vmem:[%s1922_s5 + $0xa8] sm:$0xff]  ;;  %v1167_v0 = vld [vmem:[%s1922_s5 + $0xa0] sm:$0xff] }
  0xa6   : > { %v416_v6 = vpop.f32.mrf.mxu2  ;;  %612 = vmatpush.msrb.mxu2 %v586_v61 }
  0xa7   : > { %v420_v10 = vadd.f32 %v416_v6, %v376_v3  ;;  %v1159_v3 = vld [vmem:[%s1922_s5 + $0x68] sm:$0xff] }
  0xa8   : > { %v1164_v6 = vld [vmem:[%s1922_s5 + $0x88] sm:$0xff] }
  0xa9   : > { %v424_v14 = vrot.slane %v420_v10, 1  ;;  %v430_v15 = vrot.slane %v420_v10, 7 }
  0xab   : > { %v428_v19 = vsel %vm342_vm2, %v424_v14, %v420_v10  ;;  %v431_v20 = vsel %vm281_vm0, %v429_v7, %v430_v15  ;;  %v425_v21 = vsel %vm342_vm2, %v423_v13, %v424_v14  ;;  %v1157_v7 = vld [vmem:[%s1922_s5 + $0x58] sm:$0xff] }
  0xac   : > { %v436_v22 = vmax.f32 %v428_v19, %v431_v20  ;;  %v435_v23 = vmax.f32 %v425_v21, %v434_v16 }
  0xae   : > { %v438_v26 = vmax.f32 %v420_v10, %v436_v22  ;;  %v437_v29 = vmax.f32 %v419_v63, %v435_v23  ;;  %v1161_v63 = vld [vmem:[%s1922_s5 + $0x78] sm:$0xff]  ;;  %v1155_v10 = vld [vmem:[%s1922_s5 + $0x48] sm:$0xff] }
  0xaf   : > { %641 = vmatpush.msra.mxu2 %v1161_v63 }
  0xb0   : > { %458 = vmatpush.msra.mxu3 %v438_v26 }
  0xb1   : > { %642 = vmatpush.msra.mxu2 %v1160_v1 }
  0xb2   : > { %459 = vmatpush.msra.mxu3 %v437_v29  ;;  %v1189_v29 = vld [vmem:[%s1922_s5 + $0x138] sm:$0xff] }
  0xb3   : > { %1120 = vmatmul.msk.f32.vlgmr.msra.gmra.mxu3 %vm440_vm4, %v439_v30  ;;  %643 = vmatpush.msra.mxu2 %v1159_v3  ;;  %v1198_v30 = vld [vmem:[%s1922_s5 + $0x178] sm:$0xff] }
  0xb4   : > { %480 = vmatpush.msrb.mxu3 %v479_v33  ;;  %756 = vmatpush.msra.mxu1 %v1189_v29  ;;  %v1197_v33 = vld [vmem:[%s1922_s5 + $0x170] sm:$0xff]  ;;  %v1269_v29 = vld [vmem:[%s1923_s6 + $0x1] ss:$0 sm:$0xff] }
  0xb5   : > { %644 = vmatpush.msra.mxu2 %v1158_v5  ;;  %v1207_v5 = vld [vmem:[%s1922_s5 + $0x1b0] sm:$0xff] }
  0xb6   : > { %481 = vmatpush.msrb.mxu3 %v478_v34  ;;  %757 = vmatpush.msra.mxu1 %v1188_v32  ;;  %v1177_v34 = vld [vmem:[%s1922_s5 + $0xe0] sm:$0xff] }
  0xb7   : > { %645 = vmatpush.msra.mxu2 %v1157_v7  ;;  %723 = vmatpush.msra.mxu0 %v1177_v34  ;;  %v1226_v7 = vld [vmem:[%s1922_s5 + $0x238] sm:$0xff] }
  0xb8   : > { %482 = vmatpush.msrb.mxu3 %v477_v35  ;;  %v1187_v35 = vld [vmem:[%s1922_s5 + $0x128] sm:$0xff] }
  0xb9   : > { %646 = vmatpush.msra.mxu2 %v1156_v9  ;;  %758 = vmatpush.msra.mxu1 %v1187_v35  ;;  %v1216_v9 = vld [vmem:[%s1922_s5 + $0x1f0] sm:$0xff] }
  0xba   : > { %483 = vmatpush.msrb.mxu3 %v476_v36  ;;  %v1196_v36 = vld [vmem:[%s1922_s5 + $0x168] sm:$0xff] }
  0xbb   : > { %647 = vmatpush.msra.mxu2 %v1155_v10  ;;  %v1225_v10 = vld [vmem:[%s1922_s5 + $0x230] sm:$0xff] }
  0xbc   : > { %484 = vmatpush.msrb.mxu3 %v475_v37  ;;  %v1176_v37 = vld [vmem:[%s1922_s5 + $0xd8] sm:$0xff] }
  0xbd   : > { %648 = vmatpush.msra.mxu2 %v1154_v11  ;;  %724 = vmatpush.msra.mxu0 %v1176_v37  ;;  %v1205_v11 = vld [vmem:[%s1922_s5 + $0x1a0] sm:$0xff] }
  0xbe   : > { %485 = vmatpush.msrb.mxu3 %v474_v38  ;;  %v1186_v38 = vld [vmem:[%s1922_s5 + $0x120] sm:$0xff] }
  0xbf   : > { %759 = vmatpush.msra.mxu1 %v1186_v38 }
  0xc0   : > { %486 = vmatpush.msrb.mxu3 %v473_v39  ;;  %v1195_v39 = vld [vmem:[%s1922_s5 + $0x160] sm:$0xff] }
  0xc2   : > { %487 = vmatpush.msrb.mxu3 %v472_v40  ;;  %v1175_v40 = vld [vmem:[%s1922_s5 + $0xd0] sm:$0xff] }
  0xc3   : > { %725 = vmatpush.msra.mxu0 %v1175_v40 }
  0xc4   : > { %488 = vmatpush.msrb.mxu3 %v471_v41  ;;  %v1185_v41 = vld [vmem:[%s1922_s5 + $0x118] sm:$0xff] }
  0xc5   : > { %760 = vmatpush.msra.mxu1 %v1185_v41 }
  0xc6   : > { %489 = vmatpush.msrb.mxu3 %v470_v42  ;;  %v1194_v42 = vld [vmem:[%s1922_s5 + $0x158] sm:$0xff] }
  0xc8   : > { %490 = vmatpush.msrb.mxu3 %v469_v43  ;;  %v1174_v43 = vld [vmem:[%s1922_s5 + $0xc8] sm:$0xff] }
  0xc9   : > { %726 = vmatpush.msra.mxu0 %v1174_v43 }
  0xca   : > { %491 = vmatpush.msrb.mxu3 %v468_v44  ;;  %v1184_v44 = vld [vmem:[%s1922_s5 + $0x110] sm:$0xff] }
  0xcb   : > { %761 = vmatpush.msra.mxu1 %v1184_v44 }
  0xcc   : > { %492 = vmatpush.msrb.mxu3 %v467_v45  ;;  %v1193_v45 = vld [vmem:[%s1922_s5 + $0x150] sm:$0xff] }
  0xce   : > { %493 = vmatpush.msrb.mxu3 %v466_v46  ;;  %v1173_v46 = vld [vmem:[%s1922_s5 + $0xc0] sm:$0xff] }
  0xcf   : > { %727 = vmatpush.msra.mxu0 %v1173_v46 }
  0xd0   : > { %494 = vmatpush.msrb.mxu3 %v465_v47  ;;  %v1183_v47 = vld [vmem:[%s1922_s5 + $0x108] sm:$0xff] }
  0xd1   : > { %762 = vmatpush.msra.mxu1 %v1183_v47  ;;  %v1235_v47 = vld [vmem:[%s1922_s5 + $0x270] sm:$0xff] }
  0xd2   : > { %495 = vmatpush.msrb.mxu3 %v464_v48  ;;  %v1192_v48 = vld [vmem:[%s1922_s5 + $0x148] sm:$0xff] }
  0xd3   : > { %763 = vmatpush.msra.mxu1 %v1182_v49  ;;  %v1254_v49 = vld [vmem:[%s1922_s5 + $0x2f8] sm:$0xff] }
  0xd4   : > { %676 = vmatpush.msra.mxu3 %v1170_v58 }
  0xd6   : > { %677 = vmatpush.msra.mxu3 %v1169_v60 }
  0xd8   : > { %678 = vmatpush.msra.mxu3 %v1168_v62 }
  0xda   : > { %679 = vmatpush.msra.mxu3 %v1167_v0 }
  0xdc   : > { %680 = vmatpush.msra.mxu3 %v1166_v2 }
  0xde   : > { %681 = vmatpush.msra.mxu3 %v1165_v4  ;;  %v1208_v4 = vld [vmem:[%s1922_s5 + $0x1b8] sm:$0xff] }
  0xe0   : > { %682 = vmatpush.msra.mxu3 %v1164_v6  ;;  %v1217_v6 = vld [vmem:[%s1922_s5 + $0x1f8] sm:$0xff] }
  0xe2   : > { %683 = vmatpush.msra.mxu3 %v1163_v8  ;;  %v1206_v8 = vld [vmem:[%s1922_s5 + $0x1a8] sm:$0xff] }
 0x136   : > { %v461_v55 = vpop.f32.mrf.mxu3 }
 0x137   : > { %496 = vmatmul.f32.vlgmr.msrb.gmra.mxu3 %v461_v55  ;;  %533 = vmatmul.f32.vlgmr.msrb.gmra.mxu0 %v461_v55 }
 0x138   : > { %570 = vmatmul.f32.vlgmr.msrb.gmra.mxu1 %v461_v55  ;;  %836 = vmatpush.msrb.mxu3 %v1208_v4  ;;  %v1238_v4 = vld [vmem:[%s1922_s5 + $0x280] sm:$0xff] }
 0x139   : > { %872 = vmatpush.msrb.mxu0 %v1217_v6  ;;  %907 = vmatpush.msrb.mxu1 %v1226_v7  ;;  %v1270_v6 = vld [vmem:[%s1923_s6 + $0x2] ss:$0 sm:$0xff] }
 0x13a   : > { %837 = vmatpush.msrb.mxu3 %v1207_v5  ;;  %v1247_v5 = vld [vmem:[%s1922_s5 + $0x2c0] sm:$0xff] }
 0x13b   : > { %873 = vmatpush.msrb.mxu0 %v1216_v9  ;;  %908 = vmatpush.msrb.mxu1 %v1225_v10 }
 0x13c   : > { %838 = vmatpush.msrb.mxu3 %v1206_v8 }
 0x13e   : > { %839 = vmatpush.msrb.mxu3 %v1205_v11 }
 0x1b4   : > { %v534_v12 = vpop.f32.mrf.mxu0 }
 0x1b5   : > { %v571_v13 = vpop.f32.mrf.mxu1 }
 0x1b6   : > { %v574_v14 = vmax.f32 %v534_v12, %v571_v13  ;;  %v1215_v12 = vld [vmem:[%s1922_s5 + $0x1e8] sm:$0xff] }
 0x1b7   : > { %v1224_v13 = vld [vmem:[%s1922_s5 + $0x228] sm:$0xff]  ;;  %874 = vmatpush.msrb.mxu0 %v1215_v12 }
 0x1b8   : > { %909 = vmatpush.msrb.mxu1 %v1224_v13 }
 0x1ba   : > { %v497_v15 = vpop.f32.mrf.mxu3 }
 0x1bb   : > { %v1645_v16 = vmax.f32 %v497_v15, %v574_v14  ;;  %v1204_v14 = vld [vmem:[%s1922_s5 + $0x198] sm:$0xff]  ;;  %v1214_v15 = vld [vmem:[%s1922_s5 + $0x1e0] sm:$0xff] }
 0x1bc   : > { %840 = vmatpush.msrb.mxu3 %v1204_v14  ;;  %875 = vmatpush.msrb.mxu0 %v1214_v15 }
 0x1bd   : > { %v576_v17 = vmax.f32 %v1645_v16, 0.0 }
 0x1bf   : > { %v578_v18 = vrot.slane %v576_v17, 7  ;;  %v1223_v17 = vld [vmem:[%s1922_s5 + $0x220] sm:$0xff] }
 0x1c0   : > { %910 = vmatpush.msrb.mxu1 %v1223_v17 }
 0x1c1   : > { %v581_v19 = vsel %vm281_vm0, %v578_v18, 0.0  ;;  %v580_v20 = vsel %vm281_vm0, 0.0, %v578_v18  ;;  %v1203_v18 = vld [vmem:[%s1922_s5 + $0x190] sm:$0xff] }
 0x1c2   : > { %v664_v21 = vrot.slane %v581_v19, 2  ;;  %1153 = vmatmul.msk.f32.vlgmr.msrb.gmra.mxu2 %vm301_vm3, %v580_v20  ;;  %v663_v22 = vrot.slane %v580_v20, 2  ;;  %v629_v24 = vrot.slane %v581_v19, 1  ;;  %v628_v25 = vrot.slane %v580_v20, 1  ;;  %841 = vmatpush.msrb.mxu3 %v1203_v18  ;;  %v1213_v19 = vld [vmem:[%s1922_s5 + $0x1d8] sm:$0xff] }
 0x1c3   : > { %791 = vmatpush.msrb.mxu2 %v1198_v30  ;;  %v1222_v20 = vld [vmem:[%s1922_s5 + $0x218] sm:$0xff]  ;;  %876 = vmatpush.msrb.mxu0 %v1213_v19 }
 0x1c4   : > { %v665_v23 = vsel %vm386_vm1, %v663_v22, %v664_v21  ;;  %v630_v26 = vsel %vm342_vm2, %v628_v25, %v629_v24  ;;  %911 = vmatpush.msrb.mxu1 %v1222_v20  ;;  %v1202_v21 = vld [vmem:[%s1922_s5 + $0x188] sm:$0xff]  ;;  %v1212_v22 = vld [vmem:[%s1922_s5 + $0x1d0] sm:$0xff]  ;;  %v1201_v24 = vld [vmem:[%s1922_s5 + $0x180] sm:$0xff] }
 0x1c5   : > { %1171 = vmatmul.msk.f32.vlgmr.msra.gmra.mxu3 %vm301_vm3, %v665_v23  ;;  %792 = vmatpush.msrb.mxu2 %v1197_v33  ;;  %v1221_v23 = vld [vmem:[%s1922_s5 + $0x210] sm:$0xff]  ;;  %v1211_v25 = vld [vmem:[%s1922_s5 + $0x1c8] sm:$0xff] }
 0x1c6   : > { %842 = vmatpush.msrb.mxu3 %v1202_v21  ;;  %877 = vmatpush.msrb.mxu0 %v1212_v22 }
 0x1c7   : > { %793 = vmatpush.msrb.mxu2 %v1196_v36  ;;  %912 = vmatpush.msrb.mxu1 %v1221_v23 }
 0x1c8   : > { %843 = vmatpush.msrb.mxu3 %v1201_v24  ;;  %878 = vmatpush.msrb.mxu0 %v1211_v25  ;;  %v1271_v24 = vld [vmem:[%s1923_s6 + $0x3] ss:$0 sm:$0xff] }
 0x1c9   : > { %794 = vmatpush.msrb.mxu2 %v1195_v39 }
 0x1ca   : > { %1162 = vmatmul.msk.f32.vlgmr.msra.gmra.mxu2 %vm301_vm3, %v630_v26  ;;  %v1220_v26 = vld [vmem:[%s1922_s5 + $0x208] sm:$0xff]  ;;  %879 = vmatpush.msrb.mxu0 %v1210_v27 }
 0x1cb   : > { %795 = vmatpush.msrb.mxu2 %v1194_v42  ;;  %913 = vmatpush.msrb.mxu1 %v1220_v26 }
 0x1cd   : > { %796 = vmatpush.msrb.mxu2 %v1193_v45  ;;  %914 = vmatpush.msrb.mxu1 %v1219_v28 }
 0x1cf   : > { %797 = vmatpush.msrb.mxu2 %v1192_v48  ;;  %v1245_v48 = vld [vmem:[%s1922_s5 + $0x2b8] sm:$0xff] }
 0x1d0   : > { %987 = vmatpush.msra.mxu3 %v1245_v48 }
 0x1d1   : > { %798 = vmatpush.msrb.mxu2 %v1191_v50  ;;  %v1234_v50 = vld [vmem:[%s1922_s5 + $0x268] sm:$0xff] }
 0x245   : > { %v614_v51 = vpop.f32.mrf.mxu2 }
 0x246   : > { %v617_v53 = vadd.f32 %v1268_v52, %v614_v51  ;;  %v1244_v51 = vld [vmem:[%s1922_s5 + $0x2b0] sm:$0xff] }
 0x247   : > { %v1253_v52 = vld [vmem:[%s1922_s5 + $0x2f0] sm:$0xff]  ;;  %988 = vmatpush.msra.mxu3 %v1244_v51 }
 0x248   : > { %v685_v56 = vpop.f32.mrf.mxu3 }
 0x24d   : > { %v650_v54 = vpop.f32.mrf.mxu2 }
 0x24e   : > { %v653_v55 = vadd.f32 %v650_v54, %v617_v53  ;;  %v1233_v53 = vld [vmem:[%s1922_s5 + $0x260] sm:$0xff]  ;;  %v1243_v54 = vld [vmem:[%s1922_s5 + $0x2a8] sm:$0xff] }
 0x24f   : > { %989 = vmatpush.msra.mxu3 %v1243_v54 }
 0x250   : > { %v688_v57 = vadd.f32 %v685_v56, %v653_v55  ;;  %v1252_v55 = vld [vmem:[%s1922_s5 + $0x2e8] sm:$0xff]  ;;  %v1232_v56 = vld [vmem:[%s1922_s5 + $0x258] sm:$0xff] }
 0x252   : > { %v689_v58 = vmax.f32 %v688_v57, 0.0  ;;  %v1242_v57 = vld [vmem:[%s1922_s5 + $0x2a0] sm:$0xff] }
 0x253   : > { %990 = vmatpush.msra.mxu3 %v1242_v57 }
 0x254   : > { %v691_v59 = vrot.slane %v689_v58, 7  ;;  %v1251_v58 = vld [vmem:[%s1922_s5 + $0x2e0] sm:$0xff] }
 0x256   : > { %v693_v60 = vsel %vm281_vm0, 0.0, %v691_v59  ;;  %v694_v61 = vsel %vm281_vm0, %v691_v59, 0.0  ;;  %v1231_v59 = vld [vmem:[%s1922_s5 + $0x250] sm:$0xff] }
 0x257   : > { %v743_v62 = vrot.slane %v693_v60, 1  ;;  %v744_v63 = vrot.slane %v694_v61, 1  ;;  %v778_v0 = vrot.slane %v693_v60, 2  ;;  %v779_v1 = vrot.slane %v694_v61, 2  ;;  %1181 = vmatmul.msk.f32.vlgmr.msra.gmra.mxu0 %vm301_vm3, %v693_v60  ;;  %v1241_v60 = vld [vmem:[%s1922_s5 + $0x298] sm:$0xff] }
 0x258   : > { %1022 = vmatpush.msra.mxu0 %v1254_v49  ;;  %v1250_v61 = vld [vmem:[%s1922_s5 + $0x2d8] sm:$0xff]  ;;  %991 = vmatpush.msra.mxu3 %v1241_v60 }
 0x259   : > { %v745_v2 = vsel %vm342_vm2, %v743_v62, %v744_v63  ;;  %v780_v3 = vsel %vm386_vm1, %v778_v0, %v779_v1  ;;  %v1230_v62 = vld [vmem:[%s1922_s5 + $0x248] sm:$0xff]  ;;  %v1240_v63 = vld [vmem:[%s1922_s5 + $0x290] sm:$0xff]  ;;  %v1229_v1 = vld [vmem:[%s1922_s5 + $0x240] sm:$0xff] }
 0x25a   : > { %1190 = vmatmul.msk.f32.vlgmr.msra.gmra.mxu1 %vm301_vm3, %v745_v2  ;;  %1199 = vmatmul.msk.f32.vlgmr.msrb.gmra.mxu2 %vm301_vm3, %v780_v3  ;;  %v1249_v0 = vld [vmem:[%s1922_s5 + $0x2d0] sm:$0xff]  ;;  %v1239_v2 = vld [vmem:[%s1922_s5 + $0x288] sm:$0xff] }
 0x25b   : > { %1023 = vmatpush.msra.mxu0 %v1253_v52  ;;  %992 = vmatpush.msra.mxu3 %v1240_v63  ;;  %v1248_v3 = vld [vmem:[%s1922_s5 + $0x2c8] sm:$0xff] }
 0x25d   : > { %1024 = vmatpush.msra.mxu0 %v1252_v55  ;;  %993 = vmatpush.msra.mxu3 %v1239_v2 }
 0x25f   : > { %1025 = vmatpush.msra.mxu0 %v1251_v58  ;;  %994 = vmatpush.msra.mxu3 %v1238_v4 }
 0x261   : > { %1026 = vmatpush.msra.mxu0 %v1250_v61 }
 0x263   : > { %1027 = vmatpush.msra.mxu0 %v1249_v0 }
 0x265   : > { %1028 = vmatpush.msra.mxu0 %v1248_v3 }
 0x267   : > { %1029 = vmatpush.msra.mxu0 %v1247_v5 }
 0x2d4   : > { %v729_v30 = vpop.f32.mrf.mxu0 }
 0x2d5   : > { %v732_v31 = vadd.f32 %v1269_v29, %v729_v30 }
 0x2d7   : > { %v765_v32 = vpop.f32.mrf.mxu1 }
 0x2d8   : > { %v768_v33 = vadd.f32 %v765_v32, %v732_v31 }
 0x2dd   : > { %v800_v34 = vpop.f32.mrf.mxu2 }
 0x2de   : > { %v803_v35 = vadd.f32 %v800_v34, %v768_v33 }
 0x2e0   : > { %v1813_v36 = vadd.f32 %v803_v35, %v1645_v16  ;;  %v1236_v16 = vld [vmem:[%s1922_s5 + $0x278] sm:$0xff] }
 0x2e1   : > { %951 = vmatpush.msra.mxu2 %v1236_v16 }
 0x2e2   : > { %v805_v37 = vmax.f32 %v1813_v36, 0.0 }
 0x2e3   : > { %952 = vmatpush.msra.mxu2 %v1235_v47 }
 0x2e4   : > { %v807_v38 = vrot.slane %v805_v37, 7 }
 0x2e5   : > { %953 = vmatpush.msra.mxu2 %v1234_v50 }
 0x2e6   : > { %v810_v39 = vsel %vm281_vm0, %v807_v38, 0.0  ;;  %v809_v40 = vsel %vm281_vm0, 0.0, %v807_v38 }
 0x2e7   : > { %v860_v41 = vrot.slane %v810_v39, 1  ;;  %v895_v42 = vrot.slane %v810_v39, 2  ;;  %1209 = vmatmul.msk.f32.vlgmr.msrb.gmra.mxu3 %vm301_vm3, %v809_v40  ;;  %v859_v43 = vrot.slane %v809_v40, 1  ;;  %v894_v44 = vrot.slane %v809_v40, 2  ;;  %954 = vmatpush.msra.mxu2 %v1233_v53 }
 0x2e9   : > { %v861_v45 = vsel %vm342_vm2, %v859_v43, %v860_v41  ;;  %v896_v46 = vsel %vm386_vm1, %v894_v44, %v895_v42  ;;  %955 = vmatpush.msra.mxu2 %v1232_v56 }
 0x2ea   : > { %1218 = vmatmul.msk.f32.vlgmr.msrb.gmra.mxu0 %vm301_vm3, %v861_v45  ;;  %1227 = vmatmul.msk.f32.vlgmr.msrb.gmra.mxu1 %vm301_vm3, %v896_v46 }
 0x2eb   : > { %956 = vmatpush.msra.mxu2 %v1231_v59 }
 0x2ed   : > { %957 = vmatpush.msra.mxu2 %v1230_v62 }
 0x2ef   : > { %958 = vmatpush.msra.mxu2 %v1229_v1 }
 0x367   : > { %v881_v9 = vpop.f32.mrf.mxu0  ;;  %v916_v11 = vpop.f32.mrf.mxu1 }
 0x36a   : > { %v845_v7 = vpop.f32.mrf.mxu3 }
 0x36b   : > { %v848_v8 = vadd.f32 %v1270_v6, %v845_v7 }
 0x36d   : > { %v884_v10 = vadd.f32 %v881_v9, %v848_v8 }
 0x36f   : > { %v919_v12 = vadd.f32 %v916_v11, %v884_v10 }
 0x371   : > { %v920_v13 = vmax.f32 %v919_v12, 0.0 }
 0x373   : > { %v922_v14 = vrot.slane %v920_v13, 7 }
 0x375   : > { %v925_v15 = vsel %vm281_vm0, %v922_v14, 0.0  ;;  %v924_v17 = vsel %vm281_vm0, 0.0, %v922_v14 }
 0x376   : > { %v975_v18 = vrot.slane %v925_v15, 1  ;;  %v1010_v19 = vrot.slane %v925_v15, 2  ;;  %1237 = vmatmul.msk.f32.vlgmr.msra.gmra.mxu2 %vm301_vm3, %v924_v17  ;;  %v974_v20 = vrot.slane %v924_v17, 1  ;;  %v1009_v21 = vrot.slane %v924_v17, 2 }
 0x378   : > { %v976_v22 = vsel %vm342_vm2, %v974_v20, %v975_v18  ;;  %v1011_v23 = vsel %vm386_vm1, %v1009_v21, %v1010_v19 }
 0x379   : > { %1246 = vmatmul.msk.f32.vlgmr.msra.gmra.mxu3 %vm301_vm3, %v976_v22  ;;  %1255 = vmatmul.msk.f32.vlgmr.msra.gmra.mxu0 %vm301_vm3, %v1011_v23 }
 0x3f6   : > { %v1031_v29 = vpop.f32.mrf.mxu0 }
 0x3f9   : > { %v960_v25 = vpop.f32.mrf.mxu2 }
 0x3fa   : > { %v963_v26 = vadd.f32 %v1271_v24, %v960_v25 }
 0x3fc   : > { %v996_v27 = vpop.f32.mrf.mxu3 }
 0x3fd   : > { %v999_v28 = vadd.f32 %v996_v27, %v963_v26 }
 0x3ff   : > { %v1034_v30 = vadd.f32 %v1031_v29, %v999_v28 }
 0x401   : > { %v1035_v31 = vadd.f32 %v1034_v30, %v1813_v36 }
 0x403   : > { %1036 = vst.msk [vmem:[%s276_s22] sm:$0xff] %vm301_vm3, %v1035_v31 }
 0x404 PF: > { %s17_s24 = sadd.s32 1, %s1278_s24  }
 0x405   : > { %p14_p4 = scmp.ge.s32.totalorder %s17_s24, 4  }
 0x407   :  { %16 = sbr.rel (!%p14_p4) target bundleno = 1 (0x1), region = 96 }

</bundles_post_ra>
